<compile_context>
chip_gen: v6e
topology: v6e:2x2x1
jax: 0.10.0
libtpu: 0.0.40
codegen_flags: <defaults>
</compile_context>

<pallas_src>
import functools

import jax
import jax.numpy as jnp
from jax.experimental import pallas as pl
from jax.experimental.pallas import tpu as pltpu

# ---------------- small config consistent with the module ----------------
BATCH         = 2
NUM_FRAMES    = 3
NUM_LANDMARKS = 51                                   # hardcoded in facial_graph_stream
NUM_FEATURES  = 16                                   # == H*W of the appearance map
H = W         = 4
FEATURE_SIZE  = (NUM_FRAMES - 1) * NUM_LANDMARKS     # conv channels = 102
CP            = 128                                  # channels padded to full lane width
STREAM_EMB    = 128                                  # implied by lstm input_size=128
NUM_CLASS     = 3
SEQ_H = SEQ_W = 16                                   # stldn frame resolution


# ------------------------- single fused forward kernel -------------------------
def _mmer_fused_kernel(xp_ref, wdw_ref, bn_ref, wpw_ref, fgs_w_ref, fgs_b_ref,
                       st_ref, vs_w_ref, vs_b_ref, cls_wf_ref, cls_wv_ref,
                       cls_b_ref, out_ref, *, n, h, w, cp, emb):
    f32, bf16 = jnp.float32, jnp.bfloat16
    bn = bn_ref[...]                                    # (4, cp): s1, b1, s2, b2 (folded BN)

    # ---- appearance_processing (DWConv) ----
    # depthwise 3x3, groups=C, padding=1, no bias (pure VPU work).
    # Layout (h+2, w+2, n, cp): 3x3 tap slices move only along vreg-index axes.
    xp = xp_ref[...]                                    # (h+2, w+2, n, cp) f32
    acc = jnp.zeros((h, w, n, cp), f32)
    for kh in range(3):                                 # static 3x3 taps
        for kw in range(3):
            acc = acc + xp[kh:kh + h, kw:kw + w, :, :] * wdw_ref[kh * 3 + kw, :]
    y = jnp.maximum(acc * bn[0, :] + bn[1, :], 0.0)     # BN1 (eval, folded) + ReLU

    # pointwise 1x1 conv (C -> C, no bias) == one MXU matmul over the whole batch.
    y2 = y.reshape(h * w * n, cp).astype(bf16)          # rows ordered (h, w, n)
    z = jnp.dot(y2, wpw_ref[...], preferred_element_type=f32)
    z = jnp.maximum(z * bn[2, :] + bn[3, :], 0.0)       # BN2 + ReLU; padded lanes stay exactly 0

    # ---- facial_graph_stream ----
    # TODO(synk): EdgePredictor / EfficientGCN source not provided; stand-in =
    # linear projection (+ReLU) of the flattened appearance features, expressed as
    # per-spatial-position weight blocks so no lane-merging reshape is needed.
    fgs = jnp.zeros((n, emb), f32)
    for k in range(h * w):                              # static unroll, 16 MXU accumulations
        zk = z[k * n:(k + 1) * n, :].astype(bf16)       # (n, cp) rows of spatial position k
        fgs = fgs + jnp.dot(zk, fgs_w_ref[k], preferred_element_type=f32)
    fgs = jnp.maximum(fgs + fgs_b_ref[0, :], 0.0)       # (n, emb)

    # ---- visual_stream ----
    # TODO(synk): vit_model / lstm_model source not provided; stand-in =
    # linear projection (+tanh) of the flattened stldn sequence.
    st = st_ref[...].astype(bf16)                       # (n, num_frames*H*W)
    vs = jnp.tanh(jnp.dot(st, vs_w_ref[...], preferred_element_type=f32) + vs_b_ref[0, :])

    # ---- attentive_feature_fusion + classifier ----
    # TODO(synk): attentive_feature_fusion source not provided; stand-in = channel
    # concat, folded into split classifier weights (no materialized concat).
    logits = (jnp.dot(fgs.astype(bf16), cls_wf_ref[...], preferred_element_type=f32)
              + jnp.dot(vs.astype(bf16), cls_wv_ref[...], preferred_element_type=f32)
              + cls_b_ref[0, :])                        # (n, num_class)

    # Softmax(dim=1); reciprocal on the EUP slot.
    m = jnp.max(logits, axis=-1, keepdims=True)
    e = jnp.exp(logits - m)
    out_ref[...] = e * pl.reciprocal(jnp.sum(e, axis=-1, keepdims=True), approx=True)


def _whole(shape):
    """Whole-array BlockSpec for a degenerate grid=(1,)."""
    r = len(shape)
    return pl.BlockSpec(tuple(shape), lambda i: (0,) * r)


# ------------------------- MMER_model.forward -------------------------
def mmer_forward(params, X, stldn_seq):
    n, c, h, w = X.shape
    cp = CP
    # Tiny layout prep (one fused XLA op on ~13 KB): NCHW -> (H, W, N, C),
    # 1-pixel spatial halo + zero channel pad to 128 lanes.
    xhwnc = jnp.transpose(X, (2, 3, 0, 1))                       # (h, w, n, c)
    xp = jnp.pad(xhwnc, ((1, 1), (1, 1), (0, 0), (0, cp - c)))   # (h+2, w+2, n, cp)
    st = stldn_seq.reshape(n, -1)                                # (n, num_frames*SEQ_H*SEQ_W)

    args = (xp, params["wdw"], params["bn"], params["wpw"], params["fgs_w"],
            params["fgs_b"], st, params["vs_w"], params["vs_b"],
            params["cls_wf"], params["cls_wv"], params["cls_b"])

    kernel = functools.partial(_mmer_fused_kernel, n=n, h=h, w=w, cp=cp, emb=STREAM_EMB)
    return pl.pallas_call(
        kernel,
        out_shape=jax.ShapeDtypeStruct((n, NUM_CLASS), jnp.float32),
        grid=(1,),                                               # single fused invocation
        in_specs=[_whole(a.shape) for a in args],
        out_specs=pl.BlockSpec((n, NUM_CLASS), lambda i: (0, 0)),
        compiler_params=pltpu.CompilerParams(dimension_semantics=("arbitrary",)),
    )(*args)


# ------------------------- deterministic parameter init -------------------------
def init_params(key):
    ks = jax.random.split(key, 10)
    c, cp = FEATURE_SIZE, CP
    eps = 1e-5
    p = {}
    # depthwise 3x3 (groups=C, no bias), channel-padded to 128 lanes, stored (9, cp)
    wdw = 0.1 * jax.random.normal(ks[0], (3, 3, c), jnp.float32)
    p["wdw"] = jnp.pad(wdw, ((0, 0), (0, 0), (0, cp - c))).reshape(9, cp)
    # BatchNorm2d #1/#2 (eval: running_mean=0, running_var=1) folded to scale/bias;
    # padded lanes are zero so padded channels stay exactly zero through the conv.
    g1 = 1.0 + 0.01 * jax.random.normal(ks[1], (c,), jnp.float32)
    b1 = 0.01 * jax.random.normal(ks[2], (c,), jnp.float32)
    g2 = 1.0 + 0.01 * jax.random.normal(ks[4], (c,), jnp.float32)
    b2 = 0.01 * jax.random.normal(ks[5], (c,), jnp.float32)
    s1 = g1 / jnp.sqrt(1.0 + eps)
    s2 = g2 / jnp.sqrt(1.0 + eps)
    p["bn"] = jnp.pad(jnp.stack([s1, b1, s2, b2]), ((0, 0), (0, cp - c)))   # (4, cp)
    # pointwise 1x1 conv (C -> C, no bias), padded to (128,128), bf16 for the MXU
    wpw = jax.random.normal(ks[3], (c, c), jnp.float32) / jnp.sqrt(float(c))
    p["wpw"] = jnp.pad(wpw, ((0, cp - c), (0, cp - c))).astype(jnp.bfloat16)
    # facial_graph_stream stand-in: Linear(flattened appearance -> 128), stored as
    # per-spatial-position (cp,128) blocks (rows hitting padded channels see exact zeros).
    p["fgs_w"] = (jax.random.normal(ks[6], (NUM_FEATURES, cp, STREAM_EMB), jnp.float32)
                  / jnp.sqrt(float(NUM_FEATURES * c))).astype(jnp.bfloat16)
    p["fgs_b"] = jnp.zeros((1, STREAM_EMB), jnp.float32)
    # visual_stream stand-in: Linear(num_frames*SEQ_H*SEQ_W -> 128)
    k_vs = NUM_FRAMES * SEQ_H * SEQ_W
    p["vs_w"] = (jax.random.normal(ks[7], (k_vs, STREAM_EMB), jnp.float32)
                 / jnp.sqrt(float(k_vs))).astype(jnp.bfloat16)
    p["vs_b"] = jnp.zeros((1, STREAM_EMB), jnp.float32)
    # classifier: Linear(2*stream_embedding -> num_class) + Softmax(dim=1);
    # weights split into the fgs/vs halves so the concat never materializes.
    cls_w = (jax.random.normal(ks[8], (2 * STREAM_EMB, NUM_CLASS), jnp.float32)
             / jnp.sqrt(2.0 * STREAM_EMB))
    p["cls_wf"] = cls_w[:STREAM_EMB].astype(jnp.bfloat16)
    p["cls_wv"] = cls_w[STREAM_EMB:].astype(jnp.bfloat16)
    p["cls_b"] = (0.01 * jax.random.normal(ks[9], (NUM_CLASS,), jnp.float32)).reshape(1, NUM_CLASS)
    return p


if __name__ == "__main__":
    key = jax.random.PRNGKey(0)
    kp, kx, ks = jax.random.split(key, 3)
    params = init_params(kp)
    X = jax.random.normal(kx, (BATCH, FEATURE_SIZE, H, W), jnp.float32)          # NCHW
    stldn_seq = jax.random.normal(ks, (BATCH, NUM_FRAMES, SEQ_H, SEQ_W), jnp.float32)

    out = jax.jit(mmer_forward)(params, X, stldn_seq)
    out = jax.block_until_ready(out)

    assert out.shape == (BATCH, NUM_CLASS), out.shape
    assert bool(jnp.all(jnp.isfinite(out)))
    # approx (EUP) reciprocal in the softmax -> allow tiny normalization error
    assert bool(jnp.allclose(jnp.sum(out, axis=1), 1.0, atol=1e-2))
    print("KERNEL_OK")
</pallas_src>

<mosaic_0001>
module attributes {stable_mosaic.version = 11 : i64} {
  func.func @_mmer_fused_kernel(%arg0: i32, %arg1: memref<6x6x2x128xf32, #tpu.memory_space<vmem>>, %arg2: memref<9x128xf32, #tpu.memory_space<vmem>>, %arg3: memref<4x128xf32, #tpu.memory_space<vmem>>, %arg4: memref<128x128xbf16, #tpu.memory_space<vmem>>, %arg5: memref<16x128x128xbf16, #tpu.memory_space<vmem>>, %arg6: memref<1x128xf32, #tpu.memory_space<vmem>>, %arg7: memref<2x768xf32, #tpu.memory_space<vmem>>, %arg8: memref<768x128xbf16, #tpu.memory_space<vmem>>, %arg9: memref<1x128xf32, #tpu.memory_space<vmem>>, %arg10: memref<128x3xbf16, #tpu.memory_space<vmem>>, %arg11: memref<128x3xbf16, #tpu.memory_space<vmem>>, %arg12: memref<1x3xf32, #tpu.memory_space<vmem>>, %arg13: memref<2x3xf32, #tpu.memory_space<vmem>>) attributes {dimension_semantics = [#tpu.dimension_semantics<arbitrary>], iteration_bounds = array<i64: 1>, scalar_prefetch = 0 : i64, scratch_operands = 0 : i64, tpu.core_type = #tpu.core_type<tc>, window_params = [{pipeline_mode = #tpu.pipeline_mode<synchronous>, transform_indices = @transform_0, window_bounds = array<i64: 6, 6, 2, 128>}, {pipeline_mode = #tpu.pipeline_mode<synchronous>, transform_indices = @transform_1, window_bounds = array<i64: 9, 128>}, {pipeline_mode = #tpu.pipeline_mode<synchronous>, transform_indices = @transform_2, window_bounds = array<i64: 4, 128>}, {pipeline_mode = #tpu.pipeline_mode<synchronous>, transform_indices = @transform_3, window_bounds = array<i64: 128, 128>}, {pipeline_mode = #tpu.pipeline_mode<synchronous>, transform_indices = @transform_4, window_bounds = array<i64: 16, 128, 128>}, {pipeline_mode = #tpu.pipeline_mode<synchronous>, transform_indices = @transform_5, window_bounds = array<i64: 1, 128>}, {pipeline_mode = #tpu.pipeline_mode<synchronous>, transform_indices = @transform_6, window_bounds = array<i64: 2, 768>}, {pipeline_mode = #tpu.pipeline_mode<synchronous>, transform_indices = @transform_7, window_bounds = array<i64: 768, 128>}, {pipeline_mode = #tpu.pipeline_mode<synchronous>, transform_indices = @transform_8, window_bounds = array<i64: 1, 128>}, {pipeline_mode = #tpu.pipeline_mode<synchronous>, transform_indices = @transform_9, window_bounds = array<i64: 128, 3>}, {pipeline_mode = #tpu.pipeline_mode<synchronous>, transform_indices = @transform_10, window_bounds = array<i64: 128, 3>}, {pipeline_mode = #tpu.pipeline_mode<synchronous>, transform_indices = @transform_11, window_bounds = array<i64: 1, 3>}, {pipeline_mode = #tpu.pipeline_mode<synchronous>, transform_indices = @transform_12, window_bounds = array<i64: 2, 3>}]} {
    %c0 = arith.constant 0 : index
    %c0_0 = arith.constant 0 : index
    %0 = vector.load %arg3[%c0, %c0_0] : memref<4x128xf32, #tpu.memory_space<vmem>>, vector<4x128xf32>
    %c0_1 = arith.constant 0 : index
    %c0_2 = arith.constant 0 : index
    %c0_3 = arith.constant 0 : index
    %c0_4 = arith.constant 0 : index
    %1 = vector.load %arg1[%c0_1, %c0_2, %c0_3, %c0_4] : memref<6x6x2x128xf32, #tpu.memory_space<vmem>>, vector<6x6x2x128xf32>
    %cst = arith.constant 0.000000e+00 : f32
    %2 = vector.broadcast %cst : f32 to vector<4x4x2x128xf32>
    %3 = vector.extract_strided_slice %1 {offsets = [0, 0, 0, 0], sizes = [4, 4, 2, 128], strides = [1, 1, 1, 1]} : vector<6x6x2x128xf32> to vector<4x4x2x128xf32>
    %c0_5 = arith.constant 0 : index
    %c0_6 = arith.constant 0 : index
    %4 = vector.load %arg2[%c0_5, %c0_6] : memref<9x128xf32, #tpu.memory_space<vmem>>, vector<1x128xf32>
    %5 = vector.shape_cast %4 : vector<1x128xf32> to vector<128xf32>
    %6 = vector.shape_cast %5 : vector<128xf32> to vector<1x1x1x128xf32>
    %7 = vector.broadcast %6 : vector<1x1x1x128xf32> to vector<4x4x2x128xf32>
    %8 = arith.mulf %3, %7 : vector<4x4x2x128xf32>
    %9 = arith.addf %2, %8 : vector<4x4x2x128xf32>
    %10 = vector.extract_strided_slice %1 {offsets = [0, 1, 0, 0], sizes = [4, 4, 2, 128], strides = [1, 1, 1, 1]} : vector<6x6x2x128xf32> to vector<4x4x2x128xf32>
    %c1 = arith.constant 1 : index
    %c0_7 = arith.constant 0 : index
    %11 = vector.load %arg2[%c1, %c0_7] : memref<9x128xf32, #tpu.memory_space<vmem>>, vector<1x128xf32>
    %12 = vector.shape_cast %11 : vector<1x128xf32> to vector<128xf32>
    %13 = vector.shape_cast %12 : vector<128xf32> to vector<1x1x1x128xf32>
    %14 = vector.broadcast %13 : vector<1x1x1x128xf32> to vector<4x4x2x128xf32>
    %15 = arith.mulf %10, %14 : vector<4x4x2x128xf32>
    %16 = arith.addf %9, %15 : vector<4x4x2x128xf32>
    %17 = vector.extract_strided_slice %1 {offsets = [0, 2, 0, 0], sizes = [4, 4, 2, 128], strides = [1, 1, 1, 1]} : vector<6x6x2x128xf32> to vector<4x4x2x128xf32>
    %c2 = arith.constant 2 : index
    %c0_8 = arith.constant 0 : index
    %18 = vector.load %arg2[%c2, %c0_8] : memref<9x128xf32, #tpu.memory_space<vmem>>, vector<1x128xf32>
    %19 = vector.shape_cast %18 : vector<1x128xf32> to vector<128xf32>
    %20 = vector.shape_cast %19 : vector<128xf32> to vector<1x1x1x128xf32>
    %21 = vector.broadcast %20 : vector<1x1x1x128xf32> to vector<4x4x2x128xf32>
    %22 = arith.mulf %17, %21 : vector<4x4x2x128xf32>
    %23 = arith.addf %16, %22 : vector<4x4x2x128xf32>
    %24 = vector.extract_strided_slice %1 {offsets = [1, 0, 0, 0], sizes = [4, 4, 2, 128], strides = [1, 1, 1, 1]} : vector<6x6x2x128xf32> to vector<4x4x2x128xf32>
    %c3 = arith.constant 3 : index
    %c0_9 = arith.constant 0 : index
    %25 = vector.load %arg2[%c3, %c0_9] : memref<9x128xf32, #tpu.memory_space<vmem>>, vector<1x128xf32>
    %26 = vector.shape_cast %25 : vector<1x128xf32> to vector<128xf32>
    %27 = vector.shape_cast %26 : vector<128xf32> to vector<1x1x1x128xf32>
    %28 = vector.broadcast %27 : vector<1x1x1x128xf32> to vector<4x4x2x128xf32>
    %29 = arith.mulf %24, %28 : vector<4x4x2x128xf32>
    %30 = arith.addf %23, %29 : vector<4x4x2x128xf32>
    %31 = vector.extract_strided_slice %1 {offsets = [1, 1, 0, 0], sizes = [4, 4, 2, 128], strides = [1, 1, 1, 1]} : vector<6x6x2x128xf32> to vector<4x4x2x128xf32>
    %c4 = arith.constant 4 : index
    %c0_10 = arith.constant 0 : index
    %32 = vector.load %arg2[%c4, %c0_10] : memref<9x128xf32, #tpu.memory_space<vmem>>, vector<1x128xf32>
    %33 = vector.shape_cast %32 : vector<1x128xf32> to vector<128xf32>
    %34 = vector.shape_cast %33 : vector<128xf32> to vector<1x1x1x128xf32>
    %35 = vector.broadcast %34 : vector<1x1x1x128xf32> to vector<4x4x2x128xf32>
    %36 = arith.mulf %31, %35 : vector<4x4x2x128xf32>
    %37 = arith.addf %30, %36 : vector<4x4x2x128xf32>
    %38 = vector.extract_strided_slice %1 {offsets = [1, 2, 0, 0], sizes = [4, 4, 2, 128], strides = [1, 1, 1, 1]} : vector<6x6x2x128xf32> to vector<4x4x2x128xf32>
    %c5 = arith.constant 5 : index
    %c0_11 = arith.constant 0 : index
    %39 = vector.load %arg2[%c5, %c0_11] : memref<9x128xf32, #tpu.memory_space<vmem>>, vector<1x128xf32>
    %40 = vector.shape_cast %39 : vector<1x128xf32> to vector<128xf32>
    %41 = vector.shape_cast %40 : vector<128xf32> to vector<1x1x1x128xf32>
    %42 = vector.broadcast %41 : vector<1x1x1x128xf32> to vector<4x4x2x128xf32>
    %43 = arith.mulf %38, %42 : vector<4x4x2x128xf32>
    %44 = arith.addf %37, %43 : vector<4x4x2x128xf32>
    %45 = vector.extract_strided_slice %1 {offsets = [2, 0, 0, 0], sizes = [4, 4, 2, 128], strides = [1, 1, 1, 1]} : vector<6x6x2x128xf32> to vector<4x4x2x128xf32>
    %c6 = arith.constant 6 : index
    %c0_12 = arith.constant 0 : index
    %46 = vector.load %arg2[%c6, %c0_12] : memref<9x128xf32, #tpu.memory_space<vmem>>, vector<1x128xf32>
    %47 = vector.shape_cast %46 : vector<1x128xf32> to vector<128xf32>
    %48 = vector.shape_cast %47 : vector<128xf32> to vector<1x1x1x128xf32>
    %49 = vector.broadcast %48 : vector<1x1x1x128xf32> to vector<4x4x2x128xf32>
    %50 = arith.mulf %45, %49 : vector<4x4x2x128xf32>
    %51 = arith.addf %44, %50 : vector<4x4x2x128xf32>
    %52 = vector.extract_strided_slice %1 {offsets = [2, 1, 0, 0], sizes = [4, 4, 2, 128], strides = [1, 1, 1, 1]} : vector<6x6x2x128xf32> to vector<4x4x2x128xf32>
    %c7 = arith.constant 7 : index
    %c0_13 = arith.constant 0 : index
    %53 = vector.load %arg2[%c7, %c0_13] : memref<9x128xf32, #tpu.memory_space<vmem>>, vector<1x128xf32>
    %54 = vector.shape_cast %53 : vector<1x128xf32> to vector<128xf32>
    %55 = vector.shape_cast %54 : vector<128xf32> to vector<1x1x1x128xf32>
    %56 = vector.broadcast %55 : vector<1x1x1x128xf32> to vector<4x4x2x128xf32>
    %57 = arith.mulf %52, %56 : vector<4x4x2x128xf32>
    %58 = arith.addf %51, %57 : vector<4x4x2x128xf32>
    %59 = vector.extract_strided_slice %1 {offsets = [2, 2, 0, 0], sizes = [4, 4, 2, 128], strides = [1, 1, 1, 1]} : vector<6x6x2x128xf32> to vector<4x4x2x128xf32>
    %c8 = arith.constant 8 : index
    %c0_14 = arith.constant 0 : index
    %60 = vector.load %arg2[%c8, %c0_14] : memref<9x128xf32, #tpu.memory_space<vmem>>, vector<1x128xf32>
    %61 = vector.shape_cast %60 : vector<1x128xf32> to vector<128xf32>
    %62 = vector.shape_cast %61 : vector<128xf32> to vector<1x1x1x128xf32>
    %63 = vector.broadcast %62 : vector<1x1x1x128xf32> to vector<4x4x2x128xf32>
    %64 = arith.mulf %59, %63 : vector<4x4x2x128xf32>
    %65 = arith.addf %58, %64 : vector<4x4x2x128xf32>
    %66 = vector.extract_strided_slice %0 {offsets = [0, 0], sizes = [1, 128], strides = [1, 1]} : vector<4x128xf32> to vector<1x128xf32>
    %67 = vector.shape_cast %66 : vector<1x128xf32> to vector<128xf32>
    %68 = vector.shape_cast %67 : vector<128xf32> to vector<1x1x1x128xf32>
    %69 = vector.broadcast %68 : vector<1x1x1x128xf32> to vector<4x4x2x128xf32>
    %70 = arith.mulf %65, %69 : vector<4x4x2x128xf32>
    %71 = vector.extract_strided_slice %0 {offsets = [1, 0], sizes = [1, 128], strides = [1, 1]} : vector<4x128xf32> to vector<1x128xf32>
    %72 = vector.shape_cast %71 : vector<1x128xf32> to vector<128xf32>
    %73 = vector.shape_cast %72 : vector<128xf32> to vector<1x1x1x128xf32>
    %74 = vector.broadcast %73 : vector<1x1x1x128xf32> to vector<4x4x2x128xf32>
    %75 = arith.addf %70, %74 : vector<4x4x2x128xf32>
    %cst_15 = arith.constant 0.000000e+00 : f32
    %76 = vector.broadcast %cst_15 : f32 to vector<4x4x2x128xf32>
    %77 = arith.maximumf %75, %76 : vector<4x4x2x128xf32>
    %78 = vector.shape_cast %77 : vector<4x4x2x128xf32> to vector<32x128xf32>
    %79 = arith.truncf %78 : vector<32x128xf32> to vector<32x128xbf16>
    %c0_16 = arith.constant 0 : index
    %c0_17 = arith.constant 0 : index
    %80 = vector.load %arg4[%c0_16, %c0_17] : memref<128x128xbf16, #tpu.memory_space<vmem>>, vector<128x128xbf16>
    %cst_18 = arith.constant dense<0.000000e+00> : vector<32x128xf32>
    %81 = tpu.matmul %79, %80, %cst_18 {dimension_numbers = #tpu.dot_dimension_numbers<[1], [0], [0], [1], [0, 0, 1, 1], [], []>} : vector<32x128xbf16>, vector<128x128xbf16>, vector<32x128xf32> -> vector<32x128xf32>
    %82 = vector.extract_strided_slice %0 {offsets = [2, 0], sizes = [1, 128], strides = [1, 1]} : vector<4x128xf32> to vector<1x128xf32>
    %83 = vector.shape_cast %82 : vector<1x128xf32> to vector<128xf32>
    %84 = vector.shape_cast %83 : vector<128xf32> to vector<1x128xf32>
    %85 = vector.broadcast %84 : vector<1x128xf32> to vector<32x128xf32>
    %86 = arith.mulf %81, %85 : vector<32x128xf32>
    %87 = vector.extract_strided_slice %0 {offsets = [3, 0], sizes = [1, 128], strides = [1, 1]} : vector<4x128xf32> to vector<1x128xf32>
    %88 = vector.shape_cast %87 : vector<1x128xf32> to vector<128xf32>
    %89 = vector.shape_cast %88 : vector<128xf32> to vector<1x128xf32>
    %90 = vector.broadcast %89 : vector<1x128xf32> to vector<32x128xf32>
    %91 = arith.addf %86, %90 : vector<32x128xf32>
    %cst_19 = arith.constant 0.000000e+00 : f32
    %92 = vector.broadcast %cst_19 : f32 to vector<32x128xf32>
    %93 = arith.maximumf %91, %92 : vector<32x128xf32>
    %cst_20 = arith.constant 0.000000e+00 : f32
    %94 = vector.broadcast %cst_20 : f32 to vector<2x128xf32>
    %95 = vector.extract_strided_slice %93 {offsets = [0, 0], sizes = [2, 128], strides = [1, 1]} : vector<32x128xf32> to vector<2x128xf32>
    %96 = arith.truncf %95 : vector<2x128xf32> to vector<2x128xbf16>
    %c0_21 = arith.constant 0 : index
    %c0_22 = arith.constant 0 : index
    %c0_23 = arith.constant 0 : index
    %97 = vector.load %arg5[%c0_21, %c0_22, %c0_23] : memref<16x128x128xbf16, #tpu.memory_space<vmem>>, vector<1x128x128xbf16>
    %98 = vector.shape_cast %97 : vector<1x128x128xbf16> to vector<128x128xbf16>
    %cst_24 = arith.constant dense<0.000000e+00> : vector<2x128xf32>
    %99 = tpu.matmul %96, %98, %cst_24 {dimension_numbers = #tpu.dot_dimension_numbers<[1], [0], [0], [1], [0, 0, 1, 1], [], []>} : vector<2x128xbf16>, vector<128x128xbf16>, vector<2x128xf32> -> vector<2x128xf32>
    %100 = arith.addf %94, %99 : vector<2x128xf32>
    %101 = vector.extract_strided_slice %93 {offsets = [2, 0], sizes = [2, 128], strides = [1, 1]} : vector<32x128xf32> to vector<2x128xf32>
    %102 = arith.truncf %101 : vector<2x128xf32> to vector<2x128xbf16>
    %c1_25 = arith.constant 1 : index
    %c0_26 = arith.constant 0 : index
    %c0_27 = arith.constant 0 : index
    %103 = vector.load %arg5[%c1_25, %c0_26, %c0_27] : memref<16x128x128xbf16, #tpu.memory_space<vmem>>, vector<1x128x128xbf16>
    %104 = vector.shape_cast %103 : vector<1x128x128xbf16> to vector<128x128xbf16>
    %cst_28 = arith.constant dense<0.000000e+00> : vector<2x128xf32>
    %105 = tpu.matmul %102, %104, %cst_28 {dimension_numbers = #tpu.dot_dimension_numbers<[1], [0], [0], [1], [0, 0, 1, 1], [], []>} : vector<2x128xbf16>, vector<128x128xbf16>, vector<2x128xf32> -> vector<2x128xf32>
    %106 = arith.addf %100, %105 : vector<2x128xf32>
    %107 = vector.extract_strided_slice %93 {offsets = [4, 0], sizes = [2, 128], strides = [1, 1]} : vector<32x128xf32> to vector<2x128xf32>
    %108 = arith.truncf %107 : vector<2x128xf32> to vector<2x128xbf16>
    %c2_29 = arith.constant 2 : index
    %c0_30 = arith.constant 0 : index
    %c0_31 = arith.constant 0 : index
    %109 = vector.load %arg5[%c2_29, %c0_30, %c0_31] : memref<16x128x128xbf16, #tpu.memory_space<vmem>>, vector<1x128x128xbf16>
    %110 = vector.shape_cast %109 : vector<1x128x128xbf16> to vector<128x128xbf16>
    %cst_32 = arith.constant dense<0.000000e+00> : vector<2x128xf32>
    %111 = tpu.matmul %108, %110, %cst_32 {dimension_numbers = #tpu.dot_dimension_numbers<[1], [0], [0], [1], [0, 0, 1, 1], [], []>} : vector<2x128xbf16>, vector<128x128xbf16>, vector<2x128xf32> -> vector<2x128xf32>
    %112 = arith.addf %106, %111 : vector<2x128xf32>
    %113 = vector.extract_strided_slice %93 {offsets = [6, 0], sizes = [2, 128], strides = [1, 1]} : vector<32x128xf32> to vector<2x128xf32>
    %114 = arith.truncf %113 : vector<2x128xf32> to vector<2x128xbf16>
    %c3_33 = arith.constant 3 : index
    %c0_34 = arith.constant 0 : index
    %c0_35 = arith.constant 0 : index
    %115 = vector.load %arg5[%c3_33, %c0_34, %c0_35] : memref<16x128x128xbf16, #tpu.memory_space<vmem>>, vector<1x128x128xbf16>
    %116 = vector.shape_cast %115 : vector<1x128x128xbf16> to vector<128x128xbf16>
    %cst_36 = arith.constant dense<0.000000e+00> : vector<2x128xf32>
    %117 = tpu.matmul %114, %116, %cst_36 {dimension_numbers = #tpu.dot_dimension_numbers<[1], [0], [0], [1], [0, 0, 1, 1], [], []>} : vector<2x128xbf16>, vector<128x128xbf16>, vector<2x128xf32> -> vector<2x128xf32>
    %118 = arith.addf %112, %117 : vector<2x128xf32>
    %119 = vector.extract_strided_slice %93 {offsets = [8, 0], sizes = [2, 128], strides = [1, 1]} : vector<32x128xf32> to vector<2x128xf32>
    %120 = arith.truncf %119 : vector<2x128xf32> to vector<2x128xbf16>
    %c4_37 = arith.constant 4 : index
    %c0_38 = arith.constant 0 : index
    %c0_39 = arith.constant 0 : index
    %121 = vector.load %arg5[%c4_37, %c0_38, %c0_39] : memref<16x128x128xbf16, #tpu.memory_space<vmem>>, vector<1x128x128xbf16>
    %122 = vector.shape_cast %121 : vector<1x128x128xbf16> to vector<128x128xbf16>
    %cst_40 = arith.constant dense<0.000000e+00> : vector<2x128xf32>
    %123 = tpu.matmul %120, %122, %cst_40 {dimension_numbers = #tpu.dot_dimension_numbers<[1], [0], [0], [1], [0, 0, 1, 1], [], []>} : vector<2x128xbf16>, vector<128x128xbf16>, vector<2x128xf32> -> vector<2x128xf32>
    %124 = arith.addf %118, %123 : vector<2x128xf32>
    %125 = vector.extract_strided_slice %93 {offsets = [10, 0], sizes = [2, 128], strides = [1, 1]} : vector<32x128xf32> to vector<2x128xf32>
    %126 = arith.truncf %125 : vector<2x128xf32> to vector<2x128xbf16>
    %c5_41 = arith.constant 5 : index
    %c0_42 = arith.constant 0 : index
    %c0_43 = arith.constant 0 : index
    %127 = vector.load %arg5[%c5_41, %c0_42, %c0_43] : memref<16x128x128xbf16, #tpu.memory_space<vmem>>, vector<1x128x128xbf16>
    %128 = vector.shape_cast %127 : vector<1x128x128xbf16> to vector<128x128xbf16>
    %cst_44 = arith.constant dense<0.000000e+00> : vector<2x128xf32>
    %129 = tpu.matmul %126, %128, %cst_44 {dimension_numbers = #tpu.dot_dimension_numbers<[1], [0], [0], [1], [0, 0, 1, 1], [], []>} : vector<2x128xbf16>, vector<128x128xbf16>, vector<2x128xf32> -> vector<2x128xf32>
    %130 = arith.addf %124, %129 : vector<2x128xf32>
    %131 = vector.extract_strided_slice %93 {offsets = [12, 0], sizes = [2, 128], strides = [1, 1]} : vector<32x128xf32> to vector<2x128xf32>
    %132 = arith.truncf %131 : vector<2x128xf32> to vector<2x128xbf16>
    %c6_45 = arith.constant 6 : index
    %c0_46 = arith.constant 0 : index
    %c0_47 = arith.constant 0 : index
    %133 = vector.load %arg5[%c6_45, %c0_46, %c0_47] : memref<16x128x128xbf16, #tpu.memory_space<vmem>>, vector<1x128x128xbf16>
    %134 = vector.shape_cast %133 : vector<1x128x128xbf16> to vector<128x128xbf16>
    %cst_48 = arith.constant dense<0.000000e+00> : vector<2x128xf32>
    %135 = tpu.matmul %132, %134, %cst_48 {dimension_numbers = #tpu.dot_dimension_numbers<[1], [0], [0], [1], [0, 0, 1, 1], [], []>} : vector<2x128xbf16>, vector<128x128xbf16>, vector<2x128xf32> -> vector<2x128xf32>
    %136 = arith.addf %130, %135 : vector<2x128xf32>
    %137 = vector.extract_strided_slice %93 {offsets = [14, 0], sizes = [2, 128], strides = [1, 1]} : vector<32x128xf32> to vector<2x128xf32>
    %138 = arith.truncf %137 : vector<2x128xf32> to vector<2x128xbf16>
    %c7_49 = arith.constant 7 : index
    %c0_50 = arith.constant 0 : index
    %c0_51 = arith.constant 0 : index
    %139 = vector.load %arg5[%c7_49, %c0_50, %c0_51] : memref<16x128x128xbf16, #tpu.memory_space<vmem>>, vector<1x128x128xbf16>
    %140 = vector.shape_cast %139 : vector<1x128x128xbf16> to vector<128x128xbf16>
    %cst_52 = arith.constant dense<0.000000e+00> : vector<2x128xf32>
    %141 = tpu.matmul %138, %140, %cst_52 {dimension_numbers = #tpu.dot_dimension_numbers<[1], [0], [0], [1], [0, 0, 1, 1], [], []>} : vector<2x128xbf16>, vector<128x128xbf16>, vector<2x128xf32> -> vector<2x128xf32>
    %142 = arith.addf %136, %141 : vector<2x128xf32>
    %143 = vector.extract_strided_slice %93 {offsets = [16, 0], sizes = [2, 128], strides = [1, 1]} : vector<32x128xf32> to vector<2x128xf32>
    %144 = arith.truncf %143 : vector<2x128xf32> to vector<2x128xbf16>
    %c8_53 = arith.constant 8 : index
    %c0_54 = arith.constant 0 : index
    %c0_55 = arith.constant 0 : index
    %145 = vector.load %arg5[%c8_53, %c0_54, %c0_55] : memref<16x128x128xbf16, #tpu.memory_space<vmem>>, vector<1x128x128xbf16>
    %146 = vector.shape_cast %145 : vector<1x128x128xbf16> to vector<128x128xbf16>
    %cst_56 = arith.constant dense<0.000000e+00> : vector<2x128xf32>
    %147 = tpu.matmul %144, %146, %cst_56 {dimension_numbers = #tpu.dot_dimension_numbers<[1], [0], [0], [1], [0, 0, 1, 1], [], []>} : vector<2x128xbf16>, vector<128x128xbf16>, vector<2x128xf32> -> vector<2x128xf32>
    %148 = arith.addf %142, %147 : vector<2x128xf32>
    %149 = vector.extract_strided_slice %93 {offsets = [18, 0], sizes = [2, 128], strides = [1, 1]} : vector<32x128xf32> to vector<2x128xf32>
    %150 = arith.truncf %149 : vector<2x128xf32> to vector<2x128xbf16>
    %c9 = arith.constant 9 : index
    %c0_57 = arith.constant 0 : index
    %c0_58 = arith.constant 0 : index
    %151 = vector.load %arg5[%c9, %c0_57, %c0_58] : memref<16x128x128xbf16, #tpu.memory_space<vmem>>, vector<1x128x128xbf16>
    %152 = vector.shape_cast %151 : vector<1x128x128xbf16> to vector<128x128xbf16>
    %cst_59 = arith.constant dense<0.000000e+00> : vector<2x128xf32>
    %153 = tpu.matmul %150, %152, %cst_59 {dimension_numbers = #tpu.dot_dimension_numbers<[1], [0], [0], [1], [0, 0, 1, 1], [], []>} : vector<2x128xbf16>, vector<128x128xbf16>, vector<2x128xf32> -> vector<2x128xf32>
    %154 = arith.addf %148, %153 : vector<2x128xf32>
    %155 = vector.extract_strided_slice %93 {offsets = [20, 0], sizes = [2, 128], strides = [1, 1]} : vector<32x128xf32> to vector<2x128xf32>
    %156 = arith.truncf %155 : vector<2x128xf32> to vector<2x128xbf16>
    %c10 = arith.constant 10 : index
    %c0_60 = arith.constant 0 : index
    %c0_61 = arith.constant 0 : index
    %157 = vector.load %arg5[%c10, %c0_60, %c0_61] : memref<16x128x128xbf16, #tpu.memory_space<vmem>>, vector<1x128x128xbf16>
    %158 = vector.shape_cast %157 : vector<1x128x128xbf16> to vector<128x128xbf16>
    %cst_62 = arith.constant dense<0.000000e+00> : vector<2x128xf32>
    %159 = tpu.matmul %156, %158, %cst_62 {dimension_numbers = #tpu.dot_dimension_numbers<[1], [0], [0], [1], [0, 0, 1, 1], [], []>} : vector<2x128xbf16>, vector<128x128xbf16>, vector<2x128xf32> -> vector<2x128xf32>
    %160 = arith.addf %154, %159 : vector<2x128xf32>
    %161 = vector.extract_strided_slice %93 {offsets = [22, 0], sizes = [2, 128], strides = [1, 1]} : vector<32x128xf32> to vector<2x128xf32>
    %162 = arith.truncf %161 : vector<2x128xf32> to vector<2x128xbf16>
    %c11 = arith.constant 11 : index
    %c0_63 = arith.constant 0 : index
    %c0_64 = arith.constant 0 : index
    %163 = vector.load %arg5[%c11, %c0_63, %c0_64] : memref<16x128x128xbf16, #tpu.memory_space<vmem>>, vector<1x128x128xbf16>
    %164 = vector.shape_cast %163 : vector<1x128x128xbf16> to vector<128x128xbf16>
    %cst_65 = arith.constant dense<0.000000e+00> : vector<2x128xf32>
    %165 = tpu.matmul %162, %164, %cst_65 {dimension_numbers = #tpu.dot_dimension_numbers<[1], [0], [0], [1], [0, 0, 1, 1], [], []>} : vector<2x128xbf16>, vector<128x128xbf16>, vector<2x128xf32> -> vector<2x128xf32>
    %166 = arith.addf %160, %165 : vector<2x128xf32>
    %167 = vector.extract_strided_slice %93 {offsets = [24, 0], sizes = [2, 128], strides = [1, 1]} : vector<32x128xf32> to vector<2x128xf32>
    %168 = arith.truncf %167 : vector<2x128xf32> to vector<2x128xbf16>
    %c12 = arith.constant 12 : index
    %c0_66 = arith.constant 0 : index
    %c0_67 = arith.constant 0 : index
    %169 = vector.load %arg5[%c12, %c0_66, %c0_67] : memref<16x128x128xbf16, #tpu.memory_space<vmem>>, vector<1x128x128xbf16>
    %170 = vector.shape_cast %169 : vector<1x128x128xbf16> to vector<128x128xbf16>
    %cst_68 = arith.constant dense<0.000000e+00> : vector<2x128xf32>
    %171 = tpu.matmul %168, %170, %cst_68 {dimension_numbers = #tpu.dot_dimension_numbers<[1], [0], [0], [1], [0, 0, 1, 1], [], []>} : vector<2x128xbf16>, vector<128x128xbf16>, vector<2x128xf32> -> vector<2x128xf32>
    %172 = arith.addf %166, %171 : vector<2x128xf32>
    %173 = vector.extract_strided_slice %93 {offsets = [26, 0], sizes = [2, 128], strides = [1, 1]} : vector<32x128xf32> to vector<2x128xf32>
    %174 = arith.truncf %173 : vector<2x128xf32> to vector<2x128xbf16>
    %c13 = arith.constant 13 : index
    %c0_69 = arith.constant 0 : index
    %c0_70 = arith.constant 0 : index
    %175 = vector.load %arg5[%c13, %c0_69, %c0_70] : memref<16x128x128xbf16, #tpu.memory_space<vmem>>, vector<1x128x128xbf16>
    %176 = vector.shape_cast %175 : vector<1x128x128xbf16> to vector<128x128xbf16>
    %cst_71 = arith.constant dense<0.000000e+00> : vector<2x128xf32>
    %177 = tpu.matmul %174, %176, %cst_71 {dimension_numbers = #tpu.dot_dimension_numbers<[1], [0], [0], [1], [0, 0, 1, 1], [], []>} : vector<2x128xbf16>, vector<128x128xbf16>, vector<2x128xf32> -> vector<2x128xf32>
    %178 = arith.addf %172, %177 : vector<2x128xf32>
    %179 = vector.extract_strided_slice %93 {offsets = [28, 0], sizes = [2, 128], strides = [1, 1]} : vector<32x128xf32> to vector<2x128xf32>
    %180 = arith.truncf %179 : vector<2x128xf32> to vector<2x128xbf16>
    %c14 = arith.constant 14 : index
    %c0_72 = arith.constant 0 : index
    %c0_73 = arith.constant 0 : index
    %181 = vector.load %arg5[%c14, %c0_72, %c0_73] : memref<16x128x128xbf16, #tpu.memory_space<vmem>>, vector<1x128x128xbf16>
    %182 = vector.shape_cast %181 : vector<1x128x128xbf16> to vector<128x128xbf16>
    %cst_74 = arith.constant dense<0.000000e+00> : vector<2x128xf32>
    %183 = tpu.matmul %180, %182, %cst_74 {dimension_numbers = #tpu.dot_dimension_numbers<[1], [0], [0], [1], [0, 0, 1, 1], [], []>} : vector<2x128xbf16>, vector<128x128xbf16>, vector<2x128xf32> -> vector<2x128xf32>
    %184 = arith.addf %178, %183 : vector<2x128xf32>
    %185 = vector.extract_strided_slice %93 {offsets = [30, 0], sizes = [2, 128], strides = [1, 1]} : vector<32x128xf32> to vector<2x128xf32>
    %186 = arith.truncf %185 : vector<2x128xf32> to vector<2x128xbf16>
    %c15 = arith.constant 15 : index
    %c0_75 = arith.constant 0 : index
    %c0_76 = arith.constant 0 : index
    %187 = vector.load %arg5[%c15, %c0_75, %c0_76] : memref<16x128x128xbf16, #tpu.memory_space<vmem>>, vector<1x128x128xbf16>
    %188 = vector.shape_cast %187 : vector<1x128x128xbf16> to vector<128x128xbf16>
    %cst_77 = arith.constant dense<0.000000e+00> : vector<2x128xf32>
    %189 = tpu.matmul %186, %188, %cst_77 {dimension_numbers = #tpu.dot_dimension_numbers<[1], [0], [0], [1], [0, 0, 1, 1], [], []>} : vector<2x128xbf16>, vector<128x128xbf16>, vector<2x128xf32> -> vector<2x128xf32>
    %190 = arith.addf %184, %189 : vector<2x128xf32>
    %c0_78 = arith.constant 0 : index
    %c0_79 = arith.constant 0 : index
    %191 = vector.load %arg6[%c0_78, %c0_79] : memref<1x128xf32, #tpu.memory_space<vmem>>, vector<1x128xf32>
    %192 = vector.shape_cast %191 : vector<1x128xf32> to vector<128xf32>
    %193 = vector.shape_cast %192 : vector<128xf32> to vector<1x128xf32>
    %194 = vector.broadcast %193 : vector<1x128xf32> to vector<2x128xf32>
    %195 = arith.addf %190, %194 : vector<2x128xf32>
    %cst_80 = arith.constant 0.000000e+00 : f32
    %196 = vector.broadcast %cst_80 : f32 to vector<2x128xf32>
    %197 = arith.maximumf %195, %196 : vector<2x128xf32>
    %c0_81 = arith.constant 0 : index
    %c0_82 = arith.constant 0 : index
    %198 = vector.load %arg7[%c0_81, %c0_82] : memref<2x768xf32, #tpu.memory_space<vmem>>, vector<2x768xf32>
    %199 = arith.truncf %198 : vector<2x768xf32> to vector<2x768xbf16>
    %c0_83 = arith.constant 0 : index
    %c0_84 = arith.constant 0 : index
    %200 = vector.load %arg8[%c0_83, %c0_84] : memref<768x128xbf16, #tpu.memory_space<vmem>>, vector<768x128xbf16>
    %cst_85 = arith.constant dense<0.000000e+00> : vector<2x128xf32>
    %201 = tpu.matmul %199, %200, %cst_85 {dimension_numbers = #tpu.dot_dimension_numbers<[1], [0], [0], [1], [0, 0, 1, 1], [], []>} : vector<2x768xbf16>, vector<768x128xbf16>, vector<2x128xf32> -> vector<2x128xf32>
    %c0_86 = arith.constant 0 : index
    %c0_87 = arith.constant 0 : index
    %202 = vector.load %arg9[%c0_86, %c0_87] : memref<1x128xf32, #tpu.memory_space<vmem>>, vector<1x128xf32>
    %203 = vector.shape_cast %202 : vector<1x128xf32> to vector<128xf32>
    %204 = vector.shape_cast %203 : vector<128xf32> to vector<1x128xf32>
    %205 = vector.broadcast %204 : vector<1x128xf32> to vector<2x128xf32>
    %206 = arith.addf %201, %205 : vector<2x128xf32>
    %207 = math.tanh %206 : vector<2x128xf32>
    %208 = arith.truncf %197 : vector<2x128xf32> to vector<2x128xbf16>
    %c0_88 = arith.constant 0 : index
    %c0_89 = arith.constant 0 : index
    %209 = vector.load %arg10[%c0_88, %c0_89] : memref<128x3xbf16, #tpu.memory_space<vmem>>, vector<128x3xbf16>
    %cst_90 = arith.constant dense<0.000000e+00> : vector<2x3xf32>
    %210 = tpu.matmul %208, %209, %cst_90 {dimension_numbers = #tpu.dot_dimension_numbers<[1], [0], [0], [1], [0, 0, 1, 1], [], []>} : vector<2x128xbf16>, vector<128x3xbf16>, vector<2x3xf32> -> vector<2x3xf32>
    %211 = arith.truncf %207 : vector<2x128xf32> to vector<2x128xbf16>
    %c0_91 = arith.constant 0 : index
    %c0_92 = arith.constant 0 : index
    %212 = vector.load %arg11[%c0_91, %c0_92] : memref<128x3xbf16, #tpu.memory_space<vmem>>, vector<128x3xbf16>
    %cst_93 = arith.constant dense<0.000000e+00> : vector<2x3xf32>
    %213 = tpu.matmul %211, %212, %cst_93 {dimension_numbers = #tpu.dot_dimension_numbers<[1], [0], [0], [1], [0, 0, 1, 1], [], []>} : vector<2x128xbf16>, vector<128x3xbf16>, vector<2x3xf32> -> vector<2x3xf32>
    %214 = arith.addf %210, %213 : vector<2x3xf32>
    %c0_94 = arith.constant 0 : index
    %c0_95 = arith.constant 0 : index
    %215 = vector.load %arg12[%c0_94, %c0_95] : memref<1x3xf32, #tpu.memory_space<vmem>>, vector<1x3xf32>
    %216 = vector.shape_cast %215 : vector<1x3xf32> to vector<3xf32>
    %217 = vector.shape_cast %216 : vector<3xf32> to vector<1x3xf32>
    %218 = vector.broadcast %217 : vector<1x3xf32> to vector<2x3xf32>
    %219 = arith.addf %214, %218 : vector<2x3xf32>
    %cst_96 = arith.constant dense<0xFF800000> : vector<2xf32>
    %220 = vector.multi_reduction <maximumf>, %219, %cst_96 [1] : vector<2x3xf32> to vector<2xf32>
    %221 = vector.shape_cast %220 : vector<2xf32> to vector<2x1xf32>
    %222 = vector.broadcast %221 : vector<2x1xf32> to vector<2x3xf32>
    %223 = arith.subf %219, %222 : vector<2x3xf32>
    %224 = math.exp %223 : vector<2x3xf32>
    %cst_97 = arith.constant dense<0.000000e+00> : vector<2xf32>
    %225 = vector.multi_reduction <add>, %224, %cst_97 [1] : vector<2x3xf32> to vector<2xf32>
    %226 = vector.shape_cast %225 : vector<2xf32> to vector<2x1xf32>
    %227 = tpu.reciprocal %226 {approx = true} : vector<2x1xf32> -> vector<2x1xf32>
    %228 = vector.broadcast %227 : vector<2x1xf32> to vector<2x3xf32>
    %229 = arith.mulf %224, %228 : vector<2x3xf32>
    %c0_98 = arith.constant 0 : index
    %c0_99 = arith.constant 0 : index
    %230 = vector.load %arg13[%c0_98, %c0_99] : memref<2x3xf32, #tpu.memory_space<vmem>>, vector<2x3xf32>
    tpu.vector_store %arg13[%c0_98, %c0_99], %229 {strides = array<i32>} : memref<2x3xf32, #tpu.memory_space<vmem>>, vector<2x3xf32>,
    return
  }
  func.func @transform_0(%arg0: i32) -> (i32, i32, i32, i32) {
    %c0_i32 = arith.constant 0 : i32
    %c0_i32_0 = arith.constant 0 : i32
    %c0_i32_1 = arith.constant 0 : i32
    %c0_i32_2 = arith.constant 0 : i32
    %c0_i32_3 = arith.constant 0 : i32
    return %c0_i32, %c0_i32_0, %c0_i32_1, %c0_i32_2 : i32, i32, i32, i32
  }
  func.func @transform_1(%arg0: i32) -> (i32, i32) {
    %c0_i32 = arith.constant 0 : i32
    %c0_i32_0 = arith.constant 0 : i32
    %c0_i32_1 = arith.constant 0 : i32
    return %c0_i32, %c0_i32_0 : i32, i32
  }
  func.func @transform_2(%arg0: i32) -> (i32, i32) {
    %c0_i32 = arith.constant 0 : i32
    %c0_i32_0 = arith.constant 0 : i32
    %c0_i32_1 = arith.constant 0 : i32
    return %c0_i32, %c0_i32_0 : i32, i32
  }
  func.func @transform_3(%arg0: i32) -> (i32, i32) {
    %c0_i32 = arith.constant 0 : i32
    %c0_i32_0 = arith.constant 0 : i32
    %c0_i32_1 = arith.constant 0 : i32
    return %c0_i32, %c0_i32_0 : i32, i32
  }
  func.func @transform_4(%arg0: i32) -> (i32, i32, i32) {
    %c0_i32 = arith.constant 0 : i32
    %c0_i32_0 = arith.constant 0 : i32
    %c0_i32_1 = arith.constant 0 : i32
    %c0_i32_2 = arith.constant 0 : i32
    return %c0_i32, %c0_i32_0, %c0_i32_1 : i32, i32, i32
  }
  func.func @transform_5(%arg0: i32) -> (i32, i32) {
    %c0_i32 = arith.constant 0 : i32
    %c0_i32_0 = arith.constant 0 : i32
    %c0_i32_1 = arith.constant 0 : i32
    return %c0_i32, %c0_i32_0 : i32, i32
  }
  func.func @transform_6(%arg0: i32) -> (i32, i32) {
    %c0_i32 = arith.constant 0 : i32
    %c0_i32_0 = arith.constant 0 : i32
    %c0_i32_1 = arith.constant 0 : i32
    return %c0_i32, %c0_i32_0 : i32, i32
  }
  func.func @transform_7(%arg0: i32) -> (i32, i32) {
    %c0_i32 = arith.constant 0 : i32
    %c0_i32_0 = arith.constant 0 : i32
    %c0_i32_1 = arith.constant 0 : i32
    return %c0_i32, %c0_i32_0 : i32, i32
  }
  func.func @transform_8(%arg0: i32) -> (i32, i32) {
    %c0_i32 = arith.constant 0 : i32
    %c0_i32_0 = arith.constant 0 : i32
    %c0_i32_1 = arith.constant 0 : i32
    return %c0_i32, %c0_i32_0 : i32, i32
  }
  func.func @transform_9(%arg0: i32) -> (i32, i32) {
    %c0_i32 = arith.constant 0 : i32
    %c0_i32_0 = arith.constant 0 : i32
    %c0_i32_1 = arith.constant 0 : i32
    return %c0_i32, %c0_i32_0 : i32, i32
  }
  func.func @transform_10(%arg0: i32) -> (i32, i32) {
    %c0_i32 = arith.constant 0 : i32
    %c0_i32_0 = arith.constant 0 : i32
    %c0_i32_1 = arith.constant 0 : i32
    return %c0_i32, %c0_i32_0 : i32, i32
  }
  func.func @transform_11(%arg0: i32) -> (i32, i32) {
    %c0_i32 = arith.constant 0 : i32
    %c0_i32_0 = arith.constant 0 : i32
    %c0_i32_1 = arith.constant 0 : i32
    return %c0_i32, %c0_i32_0 : i32, i32
  }
  func.func @transform_12(%arg0: i32) -> (i32, i32) {
    %c0_i32 = arith.constant 0 : i32
    %c0_i32_0 = arith.constant 0 : i32
    %c0_i32_1 = arith.constant 0 : i32
    return %c0_i32, %c0_i32_0 : i32, i32
  }
}

</mosaic_0001>

<bundles_post_ra>
// kernel: mmer_forward.1
= control target key start
LH: loop header
LB: loop body
LE: loop exit
PB: predicated region body
PF: predicated region fallthrough
CT: control target
= control target key end

     0   :  { %17 = vsyncpa [#allocation3], 0  ;;  %s5462_s0 = inlined_call_operand.vmem [shape: f32[6,6,2,128], index: 0, kind: input, shape index: {}]   ;;  %s5463_s1 = inlined_call_operand.hbm [shape: f32[9,128], index: 1, kind: input, shape index: {}]   ;;  %s5464_s2 = inlined_call_operand.vmem [shape: f32[4,128], index: 2, kind: input, shape index: {}]   ;;  %s5465_s3 = inlined_call_operand.hbm [shape: bf16[128,128], index: 3, kind: input, shape index: {}]   ;;  %s5466_s4 = inlined_call_operand.hbm [shape: bf16[16,128,128], index: 4, kind: input, shape index: {}]   ;;  %s5467_s5 = inlined_call_operand.vmem [shape: f32[1,128], index: 5, kind: input, shape index: {}]   ;;  %s5468_s6 = inlined_call_operand.vmem [shape: f32[2,768], index: 6, kind: input, shape index: {}]   ;;  %s5469_s7 = inlined_call_operand.vmem [shape: bf16[768,128], index: 7, kind: input, shape index: {}]   ;;  %s5470_s8 = inlined_call_operand.vmem [shape: f32[1,128], index: 8, kind: input, shape index: {}]   ;;  %s5471_s9 = inlined_call_operand.vmem [shape: bf16[128,3], index: 9, kind: input, shape index: {}]   ;;  %s5472_s10 = inlined_call_operand.vmem [shape: bf16[128,3], index: 10, kind: input, shape index: {}]   ;;  %s5473_s11 = inlined_call_operand.vmem [shape: f32[1,3], index: 11, kind: input, shape index: {}]   ;;  %s5474_s12 = inlined_call_operand.hbm [shape: f32[2,3], index: 12, kind: output, shape index: {}]  }
   0x1   :  { %18 = vsyncpa [#allocation6], 0 }
   0x2   :  { %19 = vsyncpa [#allocation4], 0  ;;  %s4403_s21 = smov [#allocation5]  }
   0x3   :  { %s41_s22 = sshll.u32 %s4403_s21, 4  ;;  %s42_s22 = int_to_ptr.vmem [resolvable:$true] %s41_s22 }
   0x4   :  { %s4325_s23 = scalar_lea.vmem %s42_s22, 1024  ;;  %p4330_p1 = scmp.lt.s32.totalorder %s42_s22, %s42_s22 }
   0x5   :  { %p4326_p0 = scmp.ne.s32.totalorder %s42_s22, %s4325_s23  ;;  %p4331_p2 = scmp.lt.s32.totalorder %s4325_s23, %s4325_s23 }
   0x7   :  { %p4332_p3 = por %p4331_p2, %p4330_p1 }
   0x9   :  { %p4333_p4 = pnand %p4332_p3, %p4326_p0 }
   0xb   :  { %4336 = shalt.err (!%p4333_p4)
}
   0xc   :  { %s4404_s24 = smov 64   ;;  %s4405_s25 = smov 4  }
   0xd   :  { %47 = dma.hbm_to_vmem [thread:$0]  %s5465_s3, 1024, %s42_s22, [#allocation6], %s4404_s24, %s4404_s24, %s4405_s25  }
   0xe   :  { %s4406_s28 = smov [#allocation2]  }
   0xf   :  { %s27_s29 = sshll.u32 %s4406_s28, 4  ;;  %s28_s29 = int_to_ptr.vmem [resolvable:$true] %s27_s29 }
  0x10   :  { %s4345_s30 = scalar_lea.vmem %s28_s29, 256  ;;  %p4350_p6 = scmp.lt.s32.totalorder %s28_s29, %s28_s29 }
  0x11   :  { %p4346_p5 = scmp.ne.s32.totalorder %s28_s29, %s4345_s30  ;;  %p4351_p7 = scmp.lt.s32.totalorder %s4345_s30, %s4345_s30 }
  0x13   :  { %p4352_p8 = por %p4351_p7, %p4350_p6 }
  0x15   :  { %p4353_p9 = pnand %p4352_p8, %p4346_p5 }
  0x17   :  { %4356 = shalt.err (!%p4353_p9)
}
  0x18   :  { %s4407_s13 = smov 128   ;;  %s4408_s14 = smov 8  }
  0x19   :  { %33 = dma.hbm_to_vmem [thread:$0]  %s5463_s1, 256, %s28_s29, [#allocation3], %s4407_s13, %s4407_s13, %s4408_s14  }
  0x1a   :  { %s4409_s17 = smov [#allocation7]  }
  0x1b   :  { %s53_s18 = sshll.u32 %s4409_s17, 4  ;;  %s54_s18 = int_to_ptr.vmem [resolvable:$true] %s53_s18 }
  0x1c   :  { %s4365_s3 = scalar_lea.vmem %s54_s18, 16384  ;;  %p4370_p11 = scmp.lt.s32.totalorder %s54_s18, %s54_s18 }
  0x1d   :  { %p4366_p10 = scmp.ne.s32.totalorder %s54_s18, %s4365_s3  ;;  %p4371_p12 = scmp.lt.s32.totalorder %s4365_s3, %s4365_s3 }
  0x1f   :  { %p4372_p13 = por %p4371_p12, %p4370_p11 }
  0x21   :  { %p4373_p0 = pnand %p4372_p13, %p4366_p10 }
  0x23   :  { %4376 = shalt.err (!%p4373_p0)
}
  0x24   :  { %59 = dma.hbm_to_vmem [thread:$0]  %s5466_s4, 16384, %s54_s18, [#allocation6], %s4404_s24, %s4404_s24, %s4405_s25  }
  0x25   :  { %4397 = dma.done.wait [#allocation3], 256  }
  0x26   :  { %4398 = vsyncadd [#allocation3], 4294967040 }
  0x27   :  { %4399 = dma.done.wait [#allocation6], 17408  }
  0x28   :  { %4400 = vsyncadd [#allocation6], 4294949888  ;;  %v5475_v0 = vmov 0.0   ;;  %v4109_v1 = vld [vmem:[#allocation5 + $0x38] sm:$0xff]   ;;  %v4110_v2 = vld [vmem:[#allocation5 + $0x30] sm:$0xff]   ;;  %v454_v3 = vlaneseq  ;;  %vm4412_vm0 = vmmov 0  }
  0x29   :  { %3738 = vmatprep.subr.bf16.mxu1 %v5475_v0  ;;  %3718 = vmatprep.subr.bf16.mxu0 %v4109_v1  ;;  %v4111_v4 = vld [vmem:[#allocation5 + $0x28] sm:$0xff]   ;;  %v4112_v6 = vld [vmem:[#allocation5 + $0x20] sm:$0xff]   ;;  %v4411_v7 = vmov 1983009808   ;;  %v4113_v10 = vld [vmem:[#allocation5 + $0x18] sm:$0xff]   ;;  %vm3238_vm1 = vcmask 17408  }
  0x2a   :  { %3719 = vmatpush3.bf16.msra.mxu0 %v4109_v1  ;;  %v4489_v5 = vshrl.u32 %v454_v3, 7  ;;  %v529_v8 = vunpack.c.l.s4 %v4411_v7  ;;  %v84_v11 = vld [vmem:[%s5464_s2] sm:$0xf]  ;;  %v4505_v16 = vld [vmem:[%s5462_s0 + $0x4] sm:$0x3]  ;;  %v4115_v50 = vld [vmem:[#allocation5 + $0x8] sm:$0xff]  }
  0x2b   :  { %3720 = vmatprep.subr.bf16.mxu0 %v4110_v2  ;;  %v85_v12 = vld [vmem:[%s5462_s0] sm:$0x3]  ;;  %v86_v15 = vld [vmem:[%s5462_s0 + $0x2] sm:$0x3]  ;;  %v4510_v17 = vld [vmem:[%s5462_s0 + $0x6] sm:$0x3] }
  0x2c   :  { %5479 = vst [vmem:[#allocation12_spill] sm:$0xff] %v4489_v5  ;;  %v456_v9 = vsub.s32 0, %v4489_v5  ;;  %v476_v13 = vsub.s32 1, %v4489_v5  ;;  %v530_v14 = vunpack.c.0.s8 %v529_v8  ;;  %v4114_v18 = vld [vmem:[#allocation5 + $0x10] sm:$0xff]   ;;  %v4515_v19 = vld [vmem:[%s5462_s0 + $0xc] sm:$0x3] }
  0x2d   :  { %v4520_v20 = vld [vmem:[%s5462_s0 + $0xe] sm:$0x3]  ;;  %v4525_v21 = vld [vmem:[%s5462_s0 + $0x10] sm:$0x3]  ;;  %v4530_v22 = vld [vmem:[%s5462_s0 + $0x12] sm:$0x3] }
  0x2e   :  { %3721 = vmatpush3.bf16.msra.mxu0 %v4110_v2  ;;  %v4535_v23 = vld [vmem:[%s5462_s0 + $0x18] sm:$0x3]  ;;  %v4540_v24 = vld [vmem:[%s5462_s0 + $0x1e] sm:$0x3]  ;;  %v4545_v25 = vld [vmem:[%s5462_s0 + $0x24] sm:$0x3]  ;;  %v4554_v28 = vrot.slane %v84_v11, %v456_v9  ;;  %v4556_v29 = vrot.slane %v84_v11, %v476_v13  ;;  %v4559_v30 = vsub.s32 %v530_v14, %v4489_v5 }
  0x2f   :  { %3722 = vmatprep.subr.bf16.mxu0 %v4111_v4  ;;  %v4550_v26 = vld [vmem:[%s5462_s0 + $0x2a] sm:$0x3]  ;;  %v4552_v27 = vld [vmem:[#allocation2] ss:$0 sm:$0xff]  ;;  %v89_v31 = vld [vmem:[%s5462_s0 + $0x8] sm:$0x3] }
  0x30   :  { %v126_v32 = vmul.f32 %v4552_v27, %v85_v12  ;;  %v127_v33 = vmul.f32 %v4552_v27, %v86_v15  ;;  %v128_v34 = vmul.f32 %v4552_v27, %v4505_v16  ;;  %v129_v35 = vmul.f32 %v4552_v27, %v4510_v17  ;;  %v4570_v36 = vld [vmem:[#allocation2 + $0x1] ss:$0 sm:$0xff]  ;;  %v4575_v37 = vld [vmem:[%s5462_s0 + $0x14] sm:$0x3]  ;;  %v4580_v38 = vld [vmem:[%s5462_s0 + $0x1a] sm:$0x3] }
  0x31   :  { %v130_v39 = vmul.f32 %v4552_v27, %v4515_v19  ;;  %v131_v40 = vmul.f32 %v4552_v27, %v4520_v20  ;;  %v132_v41 = vmul.f32 %v4552_v27, %v4525_v21  ;;  %v133_v42 = vmul.f32 %v4552_v27, %v4530_v22  ;;  %v4593_v43 = vld [vmem:[%s5462_s0 + $0x20] sm:$0x3]  ;;  %v4598_v44 = vld [vmem:[%s5462_s0 + $0x26] sm:$0x3]  ;;  %v4603_v45 = vld [vmem:[%s5462_s0 + $0x2c] sm:$0x3] }
  0x32   :  { %3723 = vmatpush3.bf16.msra.mxu0 %v4111_v4  ;;  %v134_v46 = vmul.f32 %v4552_v27, %v4535_v23  ;;  %v137_v47 = vmul.f32 %v4552_v27, %v4540_v24  ;;  %v138_v48 = vmul.f32 %v4552_v27, %v4545_v25  ;;  %v141_v49 = vmul.f32 %v4552_v27, %v4550_v26  ;;  %v4116_v59 = vld [vmem:[#allocation5] sm:$0xff]   ;;  %v90_v60 = vld [vmem:[%s5462_s0 + $0xa] sm:$0x3]  ;;  %v4646_v3 = vld [vmem:[%s5462_s0 + $0x22] sm:$0x3] }
  0x33   :  { %3724 = vmatprep.subr.bf16.mxu0 %v4112_v6  ;;  %v163_v51 = vmul.f32 %v4570_v36, %v86_v15  ;;  %v164_v52 = vmul.f32 %v4570_v36, %v4505_v16  ;;  %v165_v53 = vmul.f32 %v4570_v36, %v4510_v17  ;;  %v166_v54 = vmul.f32 %v4570_v36, %v89_v31  ;;  %v4633_v61 = vld [vmem:[%s5462_s0 + $0x16] sm:$0x3]  ;;  %v4648_v9 = vld [vmem:[#allocation2 + $0x2] ss:$0 sm:$0xff] }
  0x34   :  { %v167_v55 = vmul.f32 %v4570_v36, %v4520_v20  ;;  %v168_v56 = vmul.f32 %v4570_v36, %v4525_v21  ;;  %v169_v57 = vmul.f32 %v4570_v36, %v4530_v22  ;;  %v170_v58 = vmul.f32 %v4570_v36, %v4575_v37 }
  0x35   :  { %v171_v62 = vmul.f32 %v4570_v36, %v4580_v38  ;;  %v174_v63 = vmul.f32 %v4570_v36, %v4593_v43  ;;  %v175_v1 = vmul.f32 %v4570_v36, %v4598_v44  ;;  %v178_v2 = vmul.f32 %v4570_v36, %v4603_v45 }
  0x36   :  { %3725 = vmatpush3.bf16.msra.mxu0 %v4112_v6  ;;  %v179_v4 = vadd.f32 %v163_v51, %v126_v32  ;;  %v180_v6 = vadd.f32 %v164_v52, %v127_v33  ;;  %v181_v7 = vadd.f32 %v165_v53, %v128_v34  ;;  %v182_v8 = vadd.f32 %v166_v54, %v129_v35  ;;  %v4118_v32 = vld [vmem:[#allocation7 + $0x78] sm:$0xff]   ;;  %v4658_v33 = vld [vmem:[%s5462_s0 + $0x1c] sm:$0x3] }
  0x37   :  { %3726 = vmatprep.subr.bf16.mxu0 %v4113_v10  ;;  %v183_v11 = vadd.f32 %v167_v55, %v130_v39  ;;  %v184_v12 = vadd.f32 %v168_v56, %v131_v40  ;;  %v185_v13 = vadd.f32 %v169_v57, %v132_v41  ;;  %v186_v14 = vadd.f32 %v170_v58, %v133_v42  ;;  %v4669_v41 = vld [vmem:[%s5462_s0 + $0x28] sm:$0x3]  ;;  %v4120_v55 = vld [vmem:[#allocation7 + $0x70] sm:$0xff]  }
  0x38   :  { %v187_v15 = vadd.f32 %v171_v62, %v134_v46  ;;  %v191_v0 = vadd.f32 %v175_v1, %v138_v48  ;;  %v194_v5 = vadd.f32 %v178_v2, %v141_v49  ;;  %v200_v34 = vmul.f32 %v4648_v9, %v4505_v16  ;;  %3739 = vmatpush3.bf16.msra.mxu1 %v4118_v32 }
  0x39   :  { %v201_v35 = vmul.f32 %v4648_v9, %v4510_v17  ;;  %v202_v39 = vmul.f32 %v4648_v9, %v89_v31  ;;  %v203_v40 = vmul.f32 %v4648_v9, %v90_v60  ;;  %v204_v42 = vmul.f32 %v4648_v9, %v4525_v21 }
  0x3a   :  { %3727 = vmatpush3.bf16.msra.mxu0 %v4113_v10  ;;  %v4653_v10 = vld [vmem:[%s5462_s0 + $0x2e] sm:$0x3]  ;;  %v205_v46 = vmul.f32 %v4648_v9, %v4530_v22  ;;  %v206_v16 = vmul.f32 %v4648_v9, %v4575_v37  ;;  %v207_v17 = vmul.f32 %v4648_v9, %v4633_v61  ;;  %v208_v31 = vmul.f32 %v4648_v9, %v4658_v33 }
  0x3b   :  { %3728 = vmatprep.subr.bf16.mxu0 %v4114_v18  ;;  %v212_v48 = vmul.f32 %v4648_v9, %v4669_v41  ;;  %v215_v49 = vmul.f32 %v4648_v9, %v4653_v10  ;;  %v216_v51 = vadd.f32 %v200_v34, %v179_v4  ;;  %v217_v52 = vadd.f32 %v201_v35, %v180_v6  ;;  %v4720_v34 = vld [vmem:[#allocation2 + $0x4] ss:$0 sm:$0xff] }
  0x3c   :  { %v218_v53 = vadd.f32 %v202_v39, %v181_v7  ;;  %v219_v54 = vadd.f32 %v203_v40, %v182_v8  ;;  %v220_v56 = vadd.f32 %v204_v42, %v183_v11  ;;  %v221_v57 = vadd.f32 %v205_v46, %v184_v12  ;;  %v4124_v46 = vld [vmem:[#allocation7 + $0x60] sm:$0xff]  }
  0x3d   :  { %v222_v58 = vadd.f32 %v206_v16, %v185_v13  ;;  %v223_v60 = vadd.f32 %v207_v17, %v186_v14  ;;  %v5480_v62 = vmov 0.0   ;;  %v224_v1 = vadd.f32 %v208_v31, %v187_v15  ;;  %v4122_v13 = vld [vmem:[#allocation7 + $0x68] sm:$0xff]  }
  0x3e   :  { %3729 = vmatpush3.bf16.msra.mxu0 %v4114_v18  ;;  %v190_v18 = vadd.f32 %v174_v63, %v137_v47  ;;  %v211_v47 = vmul.f32 %v4648_v9, %v4646_v3  ;;  %3740 = vmatprep.subr.bf16.mxu1 %v5480_v62  ;;  %v4693_v63 = vld [vmem:[%s5462_s0 + $0x36] sm:$0x3]  ;;  %v4695_v4 = vadd.f32 %v212_v48, %v191_v0 }
  0x3f   :  { %3730 = vmatprep.subr.bf16.mxu0 %v4115_v50  ;;  %v231_v6 = vadd.f32 %v215_v49, %v194_v5  ;;  %3741 = vmatpush3.bf16.msra.mxu1 %v4120_v55  ;;  %v275_v55 = vmul.f32 %v4720_v34, %v4525_v21 }
  0x40   :  { %v227_v2 = vadd.f32 %v211_v47, %v190_v18  ;;  %3742 = vmatprep.subr.bf16.mxu1 %v5480_v62  ;;  %3754 = vmatprep.mubr.msk.bf16.mxu1 %vm4412_vm0, %v5480_v62 }
  0x42   :  { %3731 = vmatpush3.bf16.msra.mxu0 %v4115_v50  ;;  %v4687_v50 = vld [vmem:[#allocation2 + $0x3] ss:$0 sm:$0xff] }
  0x43   :  { %3732 = vmatprep.subr.bf16.mxu0 %v4116_v59  ;;  %v237_v7 = vmul.f32 %v4687_v50, %v4515_v19  ;;  %v238_v8 = vmul.f32 %v4687_v50, %v4520_v20  ;;  %v239_v11 = vmul.f32 %v4687_v50, %v4525_v21  ;;  %v241_v12 = vmul.f32 %v4687_v50, %v4535_v23 }
  0x44   :  { %v242_v0 = vmul.f32 %v4687_v50, %v4580_v38  ;;  %v243_v5 = vmul.f32 %v4687_v50, %v4658_v33  ;;  %v244_v19 = vmul.f32 %v4687_v50, %v4540_v24  ;;  %v245_v14 = vmul.f32 %v4687_v50, %v4545_v25  ;;  %3743 = vmatpush3.bf16.msra.mxu1 %v4122_v13 }
  0x45   :  { %v248_v15 = vmul.f32 %v4687_v50, %v4550_v26  ;;  %v252_v18 = vmul.f32 %v4687_v50, %v4693_v63  ;;  %v253_v32 = vadd.f32 %v237_v7, %v216_v51  ;;  %v254_v35 = vadd.f32 %v238_v8, %v217_v52  ;;  %v4731_v7 = vld [vmem:[#allocation2 + $0x5] ss:$0 sm:$0xff]  ;;  %3744 = vmatprep.subr.bf16.mxu1 %v5480_v62 }
  0x46   :  { %3733 = vmatpush3.bf16.msra.mxu0 %v4116_v59  ;;  %v240_v59 = vmul.f32 %v4687_v50, %v4530_v22  ;;  %v255_v39 = vadd.f32 %v239_v11, %v218_v53  ;;  %v257_v42 = vadd.f32 %v241_v12, %v220_v56  ;;  %v258_v16 = vadd.f32 %v242_v0, %v221_v57 }
  0x47   :  { %3758 = vmatprep.subr.bf16.mxu0 %v5480_v62  ;;  %v259_v17 = vadd.f32 %v243_v5, %v222_v58  ;;  %v260_v31 = vadd.f32 %v244_v19, %v223_v60  ;;  %v4723_v47 = vadd.f32 %v245_v14, %v224_v1  ;;  %v264_v48 = vadd.f32 %v248_v15, %v227_v2  ;;  %v4126_v1 = vld [vmem:[#allocation7 + $0x58] sm:$0xff]   ;;  %v4748_v19 = vld [vmem:[#allocation2 + $0x6] ss:$0 sm:$0xff] }
  0x48   :  { %v256_v40 = vadd.f32 %v240_v59, %v219_v54  ;;  %v4725_v49 = vadd.f32 %v252_v18, %v231_v6  ;;  %v274_v51 = vmul.f32 %v4720_v34, %v4520_v20  ;;  %v276_v52 = vmul.f32 %v4720_v34, %v4530_v22  ;;  %3745 = vmatpush3.bf16.msra.mxu1 %v4124_v46 }
  0x49   :  { %v277_v53 = vmul.f32 %v4720_v34, %v4575_v37  ;;  %v278_v54 = vmul.f32 %v4720_v34, %v4580_v38  ;;  %v279_v56 = vmul.f32 %v4720_v34, %v4658_v33  ;;  %v280_v20 = vmul.f32 %v4720_v34, %v4540_v24  ;;  %3746 = vmatprep.subr.bf16.mxu1 %v5480_v62 }
  0x4a   :  { %v281_v57 = vmul.f32 %v4720_v34, %v4593_v43  ;;  %v285_v58 = vmul.f32 %v4720_v34, %v4603_v45  ;;  %v290_v60 = vadd.f32 %v274_v51, %v253_v32  ;;  %v291_v2 = vadd.f32 %v275_v55, %v254_v35 }
  0x4b   :  { %v292_v6 = vadd.f32 %v276_v52, %v255_v39  ;;  %v293_v8 = vadd.f32 %v277_v53, %v256_v40  ;;  %v294_v11 = vadd.f32 %v278_v54, %v257_v42  ;;  %v295_v59 = vadd.f32 %v279_v56, %v258_v16 }
  0x4c   :  { %v296_v12 = vadd.f32 %v280_v20, %v259_v17  ;;  %v297_v0 = vadd.f32 %v281_v57, %v260_v31  ;;  %v301_v5 = vadd.f32 %v285_v58, %v264_v48  ;;  %v311_v13 = vmul.f32 %v4731_v7, %v4525_v21  ;;  %v4769_v31 = vld [vmem:[#allocation2 + $0x7] ss:$0 sm:$0xff]  ;;  %3747 = vmatpush3.bf16.msra.mxu1 %v4126_v1 }
  0x4d   :  { %v312_v14 = vmul.f32 %v4731_v7, %v4530_v22  ;;  %v313_v15 = vmul.f32 %v4731_v7, %v4575_v37  ;;  %v314_v18 = vmul.f32 %v4731_v7, %v4633_v61  ;;  %v315_v32 = vmul.f32 %v4731_v7, %v4658_v33  ;;  %3748 = vmatprep.subr.bf16.mxu1 %v5480_v62 }
  0x4e   :  { %v316_v35 = vmul.f32 %v4731_v7, %v4540_v24  ;;  %v317_v21 = vmul.f32 %v4731_v7, %v4593_v43  ;;  %v318_v22 = vmul.f32 %v4731_v7, %v4646_v3  ;;  %v322_v37 = vmul.f32 %v4731_v7, %v4653_v10 }
  0x4f   :  { %v327_v39 = vadd.f32 %v311_v13, %v290_v60  ;;  %v328_v40 = vadd.f32 %v312_v14, %v291_v2  ;;  %v329_v61 = vadd.f32 %v313_v15, %v292_v6  ;;  %v330_v42 = vadd.f32 %v314_v18, %v293_v8 }
  0x50   :  { %v331_v46 = vadd.f32 %v315_v32, %v294_v11  ;;  %v332_v16 = vadd.f32 %v316_v35, %v295_v59  ;;  %v333_v17 = vadd.f32 %v317_v21, %v296_v12  ;;  %v334_v48 = vadd.f32 %v318_v22, %v297_v0  ;;  %v4790_v11 = vld [vmem:[#allocation2 + $0x8] ss:$0 sm:$0xff] }
  0x51   :  { %v4771_v51 = vadd.f32 %v322_v37, %v301_v5  ;;  %v348_v55 = vmul.f32 %v4748_v19, %v4535_v23  ;;  %v349_v52 = vmul.f32 %v4748_v19, %v4580_v38  ;;  %v350_v53 = vmul.f32 %v4748_v19, %v4658_v33 }
  0x52   :  { %v351_v54 = vmul.f32 %v4748_v19, %v4540_v24  ;;  %v352_v56 = vmul.f32 %v4748_v19, %v4545_v25  ;;  %v353_v20 = vmul.f32 %v4748_v19, %v4598_v44  ;;  %v354_v23 = vmul.f32 %v4748_v19, %v4669_v41 }
  0x53   :  { %v355_v57 = vmul.f32 %v4748_v19, %v4550_v26  ;;  %v364_v58 = vadd.f32 %v348_v55, %v327_v39  ;;  %v365_v60 = vadd.f32 %v349_v52, %v328_v40  ;;  %v366_v1 = vadd.f32 %v350_v53, %v329_v61 }
  0x54   :  { %v367_v2 = vadd.f32 %v351_v54, %v330_v42  ;;  %v368_v6 = vadd.f32 %v352_v56, %v331_v46  ;;  %v369_v8 = vadd.f32 %v353_v20, %v332_v16  ;;  %v370_v59 = vadd.f32 %v354_v23, %v333_v17 }
  0x55   :  { %v371_v12 = vadd.f32 %v355_v57, %v334_v48  ;;  %v385_v25 = vmul.f32 %v4769_v31, %v4580_v38  ;;  %v386_v0 = vmul.f32 %v4769_v31, %v4658_v33  ;;  %v387_v5 = vmul.f32 %v4769_v31, %v4540_v24 }
  0x56   :  { %v388_v13 = vmul.f32 %v4769_v31, %v4593_v43  ;;  %v389_v14 = vmul.f32 %v4769_v31, %v4598_v44  ;;  %v390_v15 = vmul.f32 %v4769_v31, %v4669_v41  ;;  %v391_v18 = vmul.f32 %v4769_v31, %v4550_v26 }
  0x57   :  { %v392_v32 = vmul.f32 %v4769_v31, %v4603_v45  ;;  %v401_v35 = vadd.f32 %v385_v25, %v364_v58  ;;  %v402_v21 = vadd.f32 %v386_v0, %v365_v60  ;;  %v403_v22 = vadd.f32 %v387_v5, %v366_v1 }
  0x58   :  { %v404_v37 = vadd.f32 %v388_v13, %v367_v2  ;;  %v405_v39 = vadd.f32 %v389_v14, %v368_v6  ;;  %v406_v40 = vadd.f32 %v390_v15, %v369_v8  ;;  %v407_v61 = vadd.f32 %v391_v18, %v370_v59 }
  0x59   :  { %v408_v42 = vadd.f32 %v392_v32, %v371_v12  ;;  %v422_v46 = vmul.f32 %v4790_v11, %v4658_v33  ;;  %v423_v16 = vmul.f32 %v4790_v11, %v4540_v24  ;;  %v424_v17 = vmul.f32 %v4790_v11, %v4593_v43 }
  0x5a   :  { %v425_v48 = vmul.f32 %v4790_v11, %v4646_v3  ;;  %v426_v55 = vmul.f32 %v4790_v11, %v4669_v41  ;;  %v427_v52 = vmul.f32 %v4790_v11, %v4550_v26  ;;  %v428_v53 = vmul.f32 %v4790_v11, %v4603_v45 }
  0x5b   :  { %v429_v54 = vmul.f32 %v4790_v11, %v4653_v10  ;;  %v438_v56 = vadd.f32 %v422_v46, %v401_v35  ;;  %v439_v20 = vadd.f32 %v423_v16, %v402_v21  ;;  %v440_v23 = vadd.f32 %v424_v17, %v403_v22 }
  0x5c   :  { %v441_v57 = vadd.f32 %v425_v48, %v404_v37  ;;  %v442_v58 = vadd.f32 %v426_v55, %v405_v39  ;;  %v443_v60 = vadd.f32 %v427_v52, %v406_v40  ;;  %v444_v1 = vadd.f32 %v428_v53, %v407_v61 }
  0x5d   :  { %v445_v3 = vadd.f32 %v429_v54, %v408_v42  ;;  %v458_v2 = vmul.f32 %v4554_v28, %v438_v56  ;;  %v459_v6 = vmul.f32 %v4554_v28, %v439_v20  ;;  %v460_v8 = vmul.f32 %v4554_v28, %v440_v23 }
  0x5e   :  { %v461_v59 = vmul.f32 %v4554_v28, %v441_v57  ;;  %v462_v12 = vmul.f32 %v4554_v28, %v442_v58  ;;  %v463_v10 = vmul.f32 %v4554_v28, %v443_v60  ;;  %v464_v25 = vmul.f32 %v4554_v28, %v444_v1  ;;  %v4856_v60 = vld [vmem:[%s5462_s0 + $0x30] sm:$0x3] }
  0x5f   :  { %v465_v0 = vmul.f32 %v4554_v28, %v445_v3  ;;  %v478_v5 = vadd.f32 %v4556_v29, %v458_v2  ;;  %v479_v13 = vadd.f32 %v4556_v29, %v459_v6  ;;  %v480_v14 = vadd.f32 %v4556_v29, %v460_v8  ;;  %v4871_v2 = vld [vmem:[%s5462_s0 + $0x34] sm:$0x3] }
  0x60   :  { %v481_v15 = vadd.f32 %v4556_v29, %v461_v59  ;;  %v482_v18 = vadd.f32 %v4556_v29, %v462_v12  ;;  %v483_v32 = vadd.f32 %v4556_v29, %v463_v10  ;;  %v484_v35 = vadd.f32 %v4556_v29, %v464_v25 }
  0x61   :  { %v485_v21 = vadd.f32 %v4556_v29, %v465_v0  ;;  %v494_v22 = vmax.f32 %v478_v5, 0.0  ;;  %v495_v37 = vmax.f32 %v479_v13, 0.0  ;;  %v496_v39 = vmax.f32 %v480_v14, 0.0 }
  0x62   :  { %v497_v40 = vmax.f32 %v481_v15, 0.0  ;;  %v498_v61 = vmax.f32 %v482_v18, 0.0  ;;  %v499_v42 = vmax.f32 %v483_v32, 0.0  ;;  %v500_v46 = vmax.f32 %v484_v35, 0.0 }
  0x63   :  { %v501_v16 = vmax.f32 %v485_v21, 0.0  ;;  %v526_v17 = vcombine.low %v494_v22, %v495_v37  ;;  %v135_v48 = vmul.f32 %v4552_v27, %v4580_v38  ;;  %v136_v53 = vmul.f32 %v4552_v27, %v4658_v33 }
  0x64   :  { %v527_v55 = vcombine.low %v496_v39, %v497_v40  ;;  %v543_v52 = vcombine.low %v498_v61, %v499_v42  ;;  %v139_v54 = vmul.f32 %v4552_v27, %v4598_v44  ;;  %v140_v23 = vmul.f32 %v4552_v27, %v4669_v41  ;;  %v4901_v42 = vld [vmem:[%s5462_s0 + $0x3a] sm:$0x3] }
  0x65   :  { %v534_v56 = vrot.slane %v526_v17, %v4559_v30  ;;  %v544_v20 = vcombine.low %v500_v46, %v501_v16  ;;  %v172_v57 = vmul.f32 %v4570_v36, %v4658_v33  ;;  %v173_v1 = vmul.f32 %v4570_v36, %v4540_v24  ;;  %v4866_v33 = vld [vmem:[%s5462_s0 + $0x32] sm:$0x3] }
  0x66   :  { %v541_v58 = vrot.slane %v527_v55, %v4559_v30  ;;  %v551_v38 = vrot.slane %v543_v52, %v4559_v30  ;;  %v176_v3 = vmul.f32 %v4570_v36, %v4669_v41  ;;  %v177_v6 = vmul.f32 %v4570_v36, %v4550_v26  ;;  %v4886_v36 = vld [vmem:[%s5462_s0 + $0x38] sm:$0x3] }
  0x67   :  { %v558_v27 = vrot.slane %v544_v20, %v4559_v30  ;;  %v188_v8 = vadd.f32 %v172_v57, %v135_v48  ;;  %v209_v59 = vmul.f32 %v4648_v9, %v4540_v24  ;;  %v189_v10 = vadd.f32 %v173_v1, %v136_v53  ;;  %v115_v20 = vld [vmem:[%s5462_s0 + $0x3c] sm:$0x3]  ;;  %v116_v1 = vld [vmem:[%s5462_s0 + $0x3e] sm:$0x3] }
  0x68   :  { %v542_v12 = vcombine.low %v534_v56, %v541_v58  ;;  %v192_v25 = vadd.f32 %v176_v3, %v139_v54  ;;  %v210_v0 = vmul.f32 %v4648_v9, %v4593_v43  ;;  %v193_v13 = vadd.f32 %v177_v6, %v140_v23 }
  0x69   :  { %v559_v5 = vcombine.low %v551_v38, %v558_v27  ;;  %v213_v14 = vmul.f32 %v4648_v9, %v4550_v26  ;;  %v214_v15 = vmul.f32 %v4648_v9, %v4603_v45  ;;  %v225_v24 = vadd.f32 %v209_v59, %v188_v8 }
  0x6a   :  { %v226_v18 = vadd.f32 %v210_v0, %v189_v10  ;;  %v246_v32 = vmul.f32 %v4687_v50, %v4598_v44  ;;  %v247_v43 = vmul.f32 %v4687_v50, %v4669_v41  ;;  %v249_v37 = vmul.f32 %v4687_v50, %v4856_v60 }
  0x6b   :  { %v598_v35 = vpack.c.bf16 %v559_v5, %v542_v12  ;;  %v229_v21 = vadd.f32 %v213_v14, %v192_v25  ;;  %v230_v22 = vadd.f32 %v214_v15, %v193_v13  ;;  %v250_v9 = vmul.f32 %v4687_v50, %v4866_v33  ;;  %v119_v15 = vld [vmem:[%s5462_s0 + $0x44] sm:$0x3] }
  0x6c   :  { %v251_v39 = vmul.f32 %v4687_v50, %v4871_v2  ;;  %v262_v40 = vadd.f32 %v246_v32, %v225_v24  ;;  %v263_v61 = vadd.f32 %v247_v43, %v226_v18  ;;  %v265_v46 = vadd.f32 %v249_v37, %v4695_v4 }
  0x6d   :  { %3734 = vmatprep.mubr.bf16.mxu0 %v598_v35  ;;  %v282_v16 = vmul.f32 %v4720_v34, %v4598_v44  ;;  %v283_v17 = vmul.f32 %v4720_v34, %v4669_v41  ;;  %v284_v48 = vmul.f32 %v4720_v34, %v4550_v26  ;;  %v266_v50 = vadd.f32 %v250_v9, %v229_v21 }
  0x6e   :  { %v267_v55 = vadd.f32 %v251_v39, %v230_v22  ;;  %v286_v52 = vmul.f32 %v4720_v34, %v4866_v33  ;;  %v287_v53 = vmul.f32 %v4720_v34, %v4871_v2  ;;  %v288_v4 = vmul.f32 %v4720_v34, %v4693_v63 }
  0x6f   :  { %v289_v44 = vmul.f32 %v4720_v34, %v4886_v36  ;;  %v298_v54 = vadd.f32 %v282_v16, %v4723_v47  ;;  %v299_v56 = vadd.f32 %v283_v17, %v262_v40  ;;  %v300_v23 = vadd.f32 %v284_v48, %v263_v61  ;;  %v117_v34 = vld [vmem:[%s5462_s0 + $0x40] sm:$0x3]  ;;  %v118_v47 = vld [vmem:[%s5462_s0 + $0x42] sm:$0x3]  ;;  %v120_v17 = vld [vmem:[%s5462_s0 + $0x46] sm:$0x3] }
  0x70   :  { %v302_v57 = vadd.f32 %v286_v52, %v265_v46  ;;  %v303_v58 = vadd.f32 %v287_v53, %v266_v50  ;;  %v319_v38 = vmul.f32 %v4731_v7, %v4669_v41  ;;  %v304_v3 = vadd.f32 %v288_v4, %v267_v55 }
  0x71   :  { %v305_v27 = vadd.f32 %v289_v44, %v4725_v49  ;;  %v320_v6 = vmul.f32 %v4731_v7, %v4550_v26  ;;  %v321_v41 = vmul.f32 %v4731_v7, %v4603_v45  ;;  %v323_v8 = vmul.f32 %v4731_v7, %v4871_v2 }
  0x72   :  { %v324_v59 = vmul.f32 %v4731_v7, %v4693_v63  ;;  %v325_v12 = vmul.f32 %v4731_v7, %v4886_v36  ;;  %v326_v10 = vmul.f32 %v4731_v7, %v4901_v42  ;;  %v335_v25 = vadd.f32 %v319_v38, %v298_v54 }
  0x73   :  { %v336_v49 = vadd.f32 %v320_v6, %v299_v56  ;;  %v337_v0 = vadd.f32 %v321_v41, %v300_v23  ;;  %v356_v26 = vmul.f32 %v4748_v19, %v4856_v60  ;;  %v339_v5 = vadd.f32 %v323_v8, %v302_v57 }
  0x74   :  { %v340_v45 = vadd.f32 %v324_v59, %v303_v58  ;;  %v341_v13 = vadd.f32 %v325_v12, %v304_v3  ;;  %v342_v14 = vadd.f32 %v326_v10, %v305_v27  ;;  %v357_v24 = vmul.f32 %v4748_v19, %v4866_v33 }
  0x75   :  { %v358_v7 = vmul.f32 %v4748_v19, %v4871_v2  ;;  %v359_v18 = vmul.f32 %v4748_v19, %v4693_v63  ;;  %v360_v32 = vmul.f32 %v4748_v19, %v115_v20  ;;  %v361_v60 = vmul.f32 %v4748_v19, %v116_v1 }
  0x76   :  { %v362_v43 = vmul.f32 %v4748_v19, %v117_v34  ;;  %v363_v35 = vmul.f32 %v4748_v19, %v118_v47  ;;  %v372_v21 = vadd.f32 %v356_v26, %v335_v25  ;;  %v373_v22 = vadd.f32 %v357_v24, %v336_v49 }
  0x77   :  { %v374_v37 = vadd.f32 %v358_v7, %v337_v0  ;;  %v375_v9 = vadd.f32 %v359_v18, %v4771_v51  ;;  %v376_v39 = vadd.f32 %v360_v32, %v339_v5  ;;  %v377_v40 = vadd.f32 %v361_v60, %v340_v45 }
  0x78   :  { %v378_v61 = vadd.f32 %v362_v43, %v341_v13  ;;  %v379_v46 = vadd.f32 %v363_v35, %v342_v14  ;;  %v393_v16 = vmul.f32 %v4769_v31, %v4866_v33  ;;  %v394_v48 = vmul.f32 %v4769_v31, %v4871_v2 }
  0x79   :  { %v395_v19 = vmul.f32 %v4769_v31, %v4693_v63  ;;  %v396_v51 = vmul.f32 %v4769_v31, %v4886_v36  ;;  %v397_v50 = vmul.f32 %v4769_v31, %v116_v1  ;;  %v398_v55 = vmul.f32 %v4769_v31, %v117_v34 }
  0x7a   :  { %v399_v52 = vmul.f32 %v4769_v31, %v118_v47  ;;  %v400_v33 = vmul.f32 %v4769_v31, %v119_v15  ;;  %v409_v53 = vadd.f32 %v393_v16, %v372_v21  ;;  %v410_v4 = vadd.f32 %v394_v48, %v373_v22 }
  0x7b   :  { %v411_v44 = vadd.f32 %v395_v19, %v374_v37  ;;  %v412_v54 = vadd.f32 %v396_v51, %v375_v9  ;;  %v413_v56 = vadd.f32 %v397_v50, %v376_v39  ;;  %v414_v20 = vadd.f32 %v398_v55, %v377_v40  ;;  %v4117_v51 = vld [vmem:[#allocation7 + $0x38] sm:$0xff]  }
  0x7c   :  { %v415_v23 = vadd.f32 %v399_v52, %v378_v61  ;;  %v416_v57 = vadd.f32 %v400_v33, %v379_v46  ;;  %v430_v58 = vmul.f32 %v4790_v11, %v4871_v2  ;;  %v431_v38 = vmul.f32 %v4790_v11, %v4693_v63  ;;  %v4119_v52 = vld [vmem:[#allocation7 + $0x30] sm:$0xff]   ;;  %v4121_v33 = vld [vmem:[#allocation7 + $0x28] sm:$0xff]  }
  0x7d   :  { %v432_v1 = vmul.f32 %v4790_v11, %v4886_v36  ;;  %v433_v31 = vmul.f32 %v4790_v11, %v4901_v42  ;;  %v434_v3 = vmul.f32 %v4790_v11, %v117_v34  ;;  %v435_v27 = vmul.f32 %v4790_v11, %v118_v47 }
  0x7e   :  { %v436_v6 = vmul.f32 %v4790_v11, %v119_v15  ;;  %v437_v41 = vmul.f32 %v4790_v11, %v120_v17  ;;  %v446_v8 = vadd.f32 %v430_v58, %v409_v53  ;;  %v447_v59 = vadd.f32 %v431_v38, %v410_v4  ;;  %v4123_v53 = vld [vmem:[#allocation7 + $0x20] sm:$0xff]   ;;  %v4125_v4 = vld [vmem:[#allocation7 + $0x18] sm:$0xff]  }
  0x7f   :  { %v448_v2 = vadd.f32 %v432_v1, %v411_v44  ;;  %v449_v12 = vadd.f32 %v433_v31, %v412_v54  ;;  %v450_v10 = vadd.f32 %v434_v3, %v413_v56  ;;  %v451_v63 = vadd.f32 %v435_v27, %v414_v20  ;;  %v4127_v44 = vld [vmem:[#allocation7 + $0x10] sm:$0xff]   ;;  %v4129_v56 = vld [vmem:[#allocation7 + $0x8] sm:$0xff]  }
  0x80   :  { %v452_v25 = vadd.f32 %v436_v6, %v415_v23  ;;  %v453_v49 = vadd.f32 %v437_v41, %v416_v57  ;;  %v466_v36 = vmul.f32 %v4554_v28, %v446_v8  ;;  %v467_v42 = vmul.f32 %v4554_v28, %v447_v59  ;;  %v4128_v54 = vld [vmem:[#allocation7 + $0x50] sm:$0xff]   ;;  %v4130_v20 = vld [vmem:[#allocation7 + $0x48] sm:$0xff]   ;;  %v4131_v23 = vld [vmem:[#allocation7] sm:$0xff]  }
  0x81   :  { %v468_v34 = vmul.f32 %v4554_v28, %v448_v2  ;;  %v469_v47 = vmul.f32 %v4554_v28, %v449_v12  ;;  %v470_v0 = vmul.f32 %v4554_v28, %v450_v10  ;;  %v471_v11 = vmul.f32 %v4554_v28, %v451_v63  ;;  %3749 = vmatpush3.bf16.msra.mxu1 %v4128_v54  ;;  %v4132_v57 = vld [vmem:[#allocation7 + $0x40] sm:$0xff]   ;;  %v4316_v31 = vld [vmem:[%s5464_s2] sm:$0xf]  ;;  %v4165_v54 = vld [vmem:[#allocation7 + $0x1f8] sm:$0xff]  }
  0x82   :  { %v472_v26 = vmul.f32 %v4554_v28, %v452_v25  ;;  %v473_v5 = vmul.f32 %v4554_v28, %v453_v49  ;;  %v486_v45 = vadd.f32 %v4556_v29, %v466_v36  ;;  %v487_v13 = vadd.f32 %v4556_v29, %v467_v42  ;;  %3750 = vmatprep.subr.bf16.mxu1 %v5480_v62  ;;  %v5481_v58 = vld [vmem:[#allocation12_spill] sm:$0xff]  ;;  %v4133_v36 = vld [vmem:[#allocation7 + $0xf8] sm:$0xff]  }
  0x83   :  { %v488_v14 = vadd.f32 %v4556_v29, %v468_v34  ;;  %v489_v15 = vadd.f32 %v4556_v29, %v469_v47  ;;  %v490_v24 = vadd.f32 %v4556_v29, %v470_v0  ;;  %v491_v7 = vadd.f32 %v4556_v29, %v471_v11  ;;  %v4134_v34 = vld [vmem:[#allocation7 + $0xb8] sm:$0xff]   ;;  %v4135_v0 = vld [vmem:[#allocation7 + $0xf0] sm:$0xff]  }
  0x84   :  { %v492_v18 = vadd.f32 %v4556_v29, %v472_v26  ;;  %v493_v32 = vadd.f32 %v4556_v29, %v473_v5  ;;  %v502_v60 = vmax.f32 %v486_v45, 0.0  ;;  %v503_v43 = vmax.f32 %v487_v13, 0.0  ;;  %v4136_v11 = vld [vmem:[#allocation7 + $0xb0] sm:$0xff]   ;;  %v4137_v26 = vld [vmem:[#allocation7 + $0xe8] sm:$0xff]   ;;  %v4139_v45 = vld [vmem:[#allocation7 + $0xe0] sm:$0xff]  }
  0x85   :  { %v504_v35 = vmax.f32 %v488_v14, 0.0  ;;  %v505_v28 = vmax.f32 %v489_v15, 0.0  ;;  %v506_v21 = vmax.f32 %v490_v24, 0.0  ;;  %v507_v22 = vmax.f32 %v491_v7, 0.0  ;;  %3751 = vmatpush3.bf16.msra.mxu1 %v4130_v20  ;;  %v4138_v5 = vld [vmem:[#allocation7 + $0xa8] sm:$0xff]   ;;  %v4140_v13 = vld [vmem:[#allocation7 + $0xa0] sm:$0xff]  }
  0x86   :  { %v508_v37 = vmax.f32 %v492_v18, 0.0  ;;  %v509_v9 = vmax.f32 %v493_v32, 0.0  ;;  %v560_v39 = vcombine.low %v502_v60, %v503_v43  ;;  %3752 = vmatprep.subr.bf16.mxu1 %v5480_v62  ;;  %v715_v38 = vsub.s32 2, %v5481_v58  ;;  %v4141_v14 = vld [vmem:[#allocation7 + $0xd8] sm:$0xff]   ;;  %v4143_v24 = vld [vmem:[#allocation7 + $0xd0] sm:$0xff]   ;;  %v4145_v18 = vld [vmem:[#allocation7 + $0xc8] sm:$0xff]  }
  0x87   :  { %v561_v40 = vcombine.low %v504_v35, %v505_v28  ;;  %v577_v61 = vcombine.low %v506_v21, %v507_v22  ;;  %v723_v1 = vsub.s32 3, %v5481_v58  ;;  %v4142_v15 = vld [vmem:[#allocation7 + $0x98] sm:$0xff]   ;;  %v4144_v7 = vld [vmem:[#allocation7 + $0x90] sm:$0xff]   ;;  %v4146_v32 = vld [vmem:[#allocation7 + $0x88] sm:$0xff]  }
  0x88   :  { %v578_v46 = vcombine.low %v508_v37, %v509_v9  ;;  %v568_v16 = vrot.slane %v560_v39, %v4559_v30  ;;  %v5029_v3 = vrot.slane %v4316_v31, %v715_v38  ;;  %v4147_v60 = vld [vmem:[#allocation7 + $0xc0] sm:$0xff]   ;;  %v4149_v35 = vld [vmem:[#allocation7 + $0x178] sm:$0xff]   ;;  %v4151_v37 = vld [vmem:[#allocation7 + $0x170] sm:$0xff]  }
  0x89   :  { %v575_v17 = vrot.slane %v561_v40, %v4559_v30  ;;  %v585_v48 = vrot.slane %v577_v61, %v4559_v30  ;;  %3753 = vmatpush3.bf16.msra.mxu1 %v4132_v57  ;;  %v5031_v27 = vrot.slane %v4316_v31, %v723_v1  ;;  %v4148_v43 = vld [vmem:[#allocation7 + $0x80] sm:$0xff]   ;;  %v4150_v21 = vld [vmem:[#allocation7 + $0x138] sm:$0xff]   ;;  %v4152_v9 = vld [vmem:[#allocation7 + $0x130] sm:$0xff]  }
  0x8a   :  { %v592_v29 = vrot.slane %v578_v46, %v4559_v30  ;;  %3778 = vmatprep.subr.bf16.mxu1 %v5480_v62  ;;  %v4153_v39 = vld [vmem:[#allocation7 + $0x168] sm:$0xff]   ;;  %v4155_v61 = vld [vmem:[#allocation7 + $0x160] sm:$0xff]   ;;  %v4166_v20 = vld [vmem:[#allocation7 + $0x1b8] sm:$0xff]  }
  0x8b   :  { %v576_v19 = vcombine.low %v568_v16, %v575_v17  ;;  %v4154_v40 = vld [vmem:[#allocation7 + $0x128] sm:$0xff]   ;;  %v4156_v16 = vld [vmem:[#allocation7 + $0x120] sm:$0xff]   ;;  %v4157_v17 = vld [vmem:[#allocation7 + $0x158] sm:$0xff]  }
  0x8c   :  { %v593_v50 = vcombine.low %v585_v48, %v592_v29  ;;  %v4158_v29 = vld [vmem:[#allocation7 + $0x118] sm:$0xff]   ;;  %v4168_v57 = vld [vmem:[#allocation7 + $0x1b0] sm:$0xff]   ;;  %v4169_v58 = vld [vmem:[#allocation7 + $0x1e8] sm:$0xff]  }
  0x8d   :  { %v4170_v38 = vld [vmem:[#allocation7 + $0x1a8] sm:$0xff]   ;;  %v4171_v1 = vld [vmem:[#allocation7 + $0x1e0] sm:$0xff]  }
  0x8e   :  { %v599_v55 = vpack.c.bf16 %v593_v50, %v576_v19  ;;  %v4159_v19 = vld [vmem:[#allocation7 + $0x150] sm:$0xff]   ;;  %v4172_v31 = vld [vmem:[#allocation7 + $0x1a0] sm:$0xff]  }
  0x8f   :  { %v4160_v50 = vld [vmem:[#allocation7 + $0x110] sm:$0xff]  }
  0x90   :  { %3735 = vmatmul.mubr.bf16.vlgmr.msra.gmra.mxu0 %v599_v55  ;;  %v4161_v55 = vld [vmem:[#allocation7 + $0x148] sm:$0xff]  }
  0x91   :  { %3759 = vmatpush3.bf16.msra.mxu0 %v4117_v51  ;;  %3774 = vmatprep.mubr.msk.bf16.mxu0 %vm4412_vm0, %v5480_v62 }
  0x92   :  { %3760 = vmatprep.subr.bf16.mxu0 %v5480_v62 }
  0x95   :  { %3761 = vmatpush3.bf16.msra.mxu0 %v4119_v52 }
  0x96   :  { %3762 = vmatprep.subr.bf16.mxu0 %v5480_v62 }
  0x99   :  { %3763 = vmatpush3.bf16.msra.mxu0 %v4121_v33  ;;  %v4162_v33 = vld [vmem:[#allocation7 + $0x108] sm:$0xff]  }
  0x9a   :  { %3764 = vmatprep.subr.bf16.mxu0 %v5480_v62 }
  0x9d   :  { %3765 = vmatpush3.bf16.msra.mxu0 %v4123_v53  ;;  %v4163_v53 = vld [vmem:[#allocation7 + $0x140] sm:$0xff]  }
  0x9e   :  { %3766 = vmatprep.subr.bf16.mxu0 %v5480_v62 }
  0xa1   :  { %3767 = vmatpush3.bf16.msra.mxu0 %v4125_v4 }
  0xa2   :  { %3768 = vmatprep.subr.bf16.mxu0 %v5480_v62 }
  0xa5   :  { %3769 = vmatpush3.bf16.msra.mxu0 %v4127_v44  ;;  %v4164_v44 = vld [vmem:[#allocation7 + $0x100] sm:$0xff]  }
  0xa6   :  { %3770 = vmatprep.subr.bf16.mxu0 %v5480_v62 }
  0xa9   :  { %3771 = vmatpush3.bf16.msra.mxu0 %v4129_v56 }
  0xaa   :  { %3772 = vmatprep.subr.bf16.mxu0 %v5480_v62 }
  0xad   :  { %3773 = vmatpush3.bf16.msra.mxu0 %v4131_v23  ;;  %v4167_v23 = vld [vmem:[#allocation7 + $0x1f0] sm:$0xff]  }
  0xae   :  { %3798 = vmatprep.subr.bf16.mxu0 %v5480_v62 }
 0x150   :  { %v3736_v6 = vpop.f32.mrf.mxu0 }
 0x151   :  { %v719_v41 = vmul.f32 %v3736_v6, %v5029_v3  ;;  %v4175_v6 = vld [vmem:[#allocation7 + $0x1d0] sm:$0xff]  }
 0x152   :  { %v698_v8 = vpop.f32.mrf.mxu0 }
 0x153   :  { %v5035_v59 = vadd.f32 %v5031_v27, %v719_v41  ;;  %v717_v2 = vmul.f32 %v5029_v3, %v698_v8  ;;  %v4176_v41 = vld [vmem:[#allocation7 + $0x190] sm:$0xff]   ;;  %v4177_v8 = vld [vmem:[#allocation7 + $0x1c8] sm:$0xff]  }
 0x154   :  { %v3737_v12 = vpop.f32.mrf.mxu0 }
 0x155   :  { %v725_v10 = vadd.f32 %v5031_v27, %v717_v2  ;;  %v720_v63 = vmul.f32 %v3737_v12, %v5029_v3  ;;  %v4178_v2 = vld [vmem:[#allocation7 + $0x188] sm:$0xff]   ;;  %v4179_v12 = vld [vmem:[#allocation7 + $0x1c0] sm:$0xff]  }
 0x156   :  { %v701_v46 = vpop.f32.mrf.mxu0 }
 0x157   :  { %v729_v25 = vmax.f32 %v725_v10, 0.0  ;;  %v5041_v49 = vadd.f32 %v5031_v27, %v720_v63  ;;  %v718_v48 = vmul.f32 %v5029_v3, %v701_v46  ;;  %v4173_v3 = vld [vmem:[#allocation7 + $0x1d8] sm:$0xff]   ;;  %v4180_v10 = vld [vmem:[#allocation7 + $0x180] sm:$0xff]  }
 0x158   :  { %v4181_v63 = vld [vmem:[#allocation7 + $0x278] sm:$0xff]  }
 0x159   :  { %v733_v42 = vpack.c.bf16 %v729_v25, %v729_v25  ;;  %v726_v51 = vadd.f32 %v5031_v27, %v718_v48  ;;  %v4174_v27 = vld [vmem:[#allocation7 + $0x198] sm:$0xff]   ;;  %v4209_v48 = vld [vmem:[#allocation7 + $0x2c8] sm:$0xff]  }
 0x15a   :  { %v4206_v46 = vld [vmem:[#allocation7 + $0x298] sm:$0xff]  }
 0x15b   :  { %3775 = vmatmul.mubr.bf16.vlgmr.msra.gmra.mxu0 %v733_v42  ;;  %v768_v47 = vrot.slane %v733_v42, 1  ;;  %v1071_v28 = vrot.slane %v733_v42, 3  ;;  %v963_v22 = vrot.slane %v733_v42, 2  ;;  %v730_v52 = vmax.f32 %v726_v51, 0.0  ;;  %v4212_v51 = vld [vmem:[#allocation7 + $0x280] sm:$0xff]  }
 0x15c   :  { %3799 = vmatpush3.bf16.msra.mxu0 %v4133_v36  ;;  %3814 = vmatprep.mubr.msk.bf16.mxu0 %vm4412_vm0, %v5480_v62  ;;  %v4182_v36 = vld [vmem:[#allocation7 + $0x238] sm:$0xff]  }
 0x15d   :  { %3755 = vmatmul.mubr.bf16.vlgmr.msra.gmra.mxu1 %v768_v47  ;;  %3800 = vmatprep.subr.bf16.mxu0 %v5480_v62  ;;  %v5081_v4 = vpack.c.bf16 %v730_v52, %v730_v52  ;;  %v4184_v47 = vld [vmem:[#allocation7 + $0x230] sm:$0xff]   ;;  %v4214_v52 = vld [vmem:[#allocation7 + $0x338] sm:$0xff]  }
 0x15e   :  { %3779 = vmatpush3.bf16.msra.mxu1 %v4134_v34  ;;  %3794 = vmatprep.mubr.msk.bf16.mxu1 %vm4412_vm0, %v5480_v62  ;;  %v4183_v34 = vld [vmem:[#allocation7 + $0x270] sm:$0xff]  }
 0x15f   :  { %3780 = vmatprep.subr.bf16.mxu1 %v5480_v62  ;;  %v1287_v56 = vrot.slane %v5081_v4, 1  ;;  %v1503_v25 = vrot.slane %v5081_v4, 3  ;;  %v1395_v42 = vrot.slane %v5081_v4, 2 }
 0x160   :  { %3801 = vmatpush3.bf16.msra.mxu0 %v4135_v0  ;;  %v4185_v0 = vld [vmem:[#allocation7 + $0x268] sm:$0xff]  }
 0x161   :  { %3802 = vmatprep.subr.bf16.mxu0 %v5480_v62 }
 0x162   :  { %3781 = vmatpush3.bf16.msra.mxu1 %v4136_v11  ;;  %v4186_v11 = vld [vmem:[#allocation7 + $0x228] sm:$0xff]  }
 0x163   :  { %3782 = vmatprep.subr.bf16.mxu1 %v5480_v62 }
 0x164   :  { %3803 = vmatpush3.bf16.msra.mxu0 %v4137_v26  ;;  %v4187_v26 = vld [vmem:[#allocation7 + $0x260] sm:$0xff]  }
 0x165   :  { %3804 = vmatprep.subr.bf16.mxu0 %v5480_v62 }
 0x166   :  { %3783 = vmatpush3.bf16.msra.mxu1 %v4138_v5  ;;  %v4188_v5 = vld [vmem:[#allocation7 + $0x220] sm:$0xff]  }
 0x167   :  { %3784 = vmatprep.subr.bf16.mxu1 %v5480_v62 }
 0x168   :  { %3805 = vmatpush3.bf16.msra.mxu0 %v4139_v45  ;;  %v4189_v45 = vld [vmem:[#allocation7 + $0x258] sm:$0xff]  }
 0x169   :  { %3806 = vmatprep.subr.bf16.mxu0 %v5480_v62 }
 0x16a   :  { %3785 = vmatpush3.bf16.msra.mxu1 %v4140_v13  ;;  %v4190_v13 = vld [vmem:[#allocation7 + $0x218] sm:$0xff]  }
 0x16b   :  { %3786 = vmatprep.subr.bf16.mxu1 %v5480_v62 }
 0x16c   :  { %3807 = vmatpush3.bf16.msra.mxu0 %v4141_v14  ;;  %v4191_v14 = vld [vmem:[#allocation7 + $0x250] sm:$0xff]  }
 0x16d   :  { %3808 = vmatprep.subr.bf16.mxu0 %v5480_v62 }
 0x16e   :  { %3787 = vmatpush3.bf16.msra.mxu1 %v4142_v15  ;;  %v4192_v15 = vld [vmem:[#allocation7 + $0x210] sm:$0xff]  }
 0x16f   :  { %3788 = vmatprep.subr.bf16.mxu1 %v5480_v62 }
 0x170   :  { %3809 = vmatpush3.bf16.msra.mxu0 %v4143_v24  ;;  %v4193_v24 = vld [vmem:[#allocation7 + $0x248] sm:$0xff]  }
 0x171   :  { %3810 = vmatprep.subr.bf16.mxu0 %v5480_v62 }
 0x172   :  { %3789 = vmatpush3.bf16.msra.mxu1 %v4144_v7  ;;  %v731_v7 = vmax.f32 %v5035_v59, 0.0 }
 0x173   :  { %3790 = vmatprep.subr.bf16.mxu1 %v5480_v62 }
 0x174   :  { %3811 = vmatpush3.bf16.msra.mxu0 %v4145_v18  ;;  %v4194_v18 = vld [vmem:[#allocation7 + $0x208] sm:$0xff]  }
 0x175   :  { %3812 = vmatprep.subr.bf16.mxu0 %v5480_v62 }
 0x176   :  { %3791 = vmatpush3.bf16.msra.mxu1 %v4146_v32  ;;  %v4195_v32 = vld [vmem:[#allocation7 + $0x240] sm:$0xff]  }
 0x177   :  { %3792 = vmatprep.subr.bf16.mxu1 %v5480_v62 }
 0x178   :  { %3813 = vmatpush3.bf16.msra.mxu0 %v4147_v60  ;;  %v5128_v60 = vpack.c.bf16 %v731_v7, %v731_v7  ;;  %v4238_v7 = vld [vmem:[#allocation7 + $0x398] sm:$0xff]  }
 0x179   :  { %3838 = vmatprep.subr.bf16.mxu0 %v5480_v62 }
 0x17a   :  { %3793 = vmatpush3.bf16.msra.mxu1 %v4148_v43  ;;  %v4196_v43 = vld [vmem:[#allocation7 + $0x200] sm:$0xff]   ;;  %v1719_v59 = vrot.slane %v5128_v60, 1 }
 0x17b   :  { %3815 = vmatmul.mubr.bf16.vlgmr.msra.gmra.mxu0 %v1071_v28  ;;  %3818 = vmatprep.subr.bf16.mxu1 %v5480_v62  ;;  %v4198_v28 = vld [vmem:[#allocation7 + $0x2b8] sm:$0xff]  }
 0x17c   :  { %3839 = vmatpush3.bf16.msra.mxu0 %v4149_v35  ;;  %3854 = vmatprep.mubr.msk.bf16.mxu0 %vm4412_vm0, %v5480_v62  ;;  %v4197_v35 = vld [vmem:[#allocation7 + $0x2f8] sm:$0xff]  }
 0x17d   :  { %3795 = vmatmul.mubr.bf16.vlgmr.msra.gmra.mxu1 %v963_v22  ;;  %3840 = vmatprep.subr.bf16.mxu0 %v5480_v62  ;;  %v4200_v22 = vld [vmem:[#allocation7 + $0x2b0] sm:$0xff]  }
 0x17e   :  { %3819 = vmatpush3.bf16.msra.mxu1 %v4150_v21  ;;  %3834 = vmatprep.mubr.msk.bf16.mxu1 %vm4412_vm0, %v5480_v62  ;;  %v4199_v21 = vld [vmem:[#allocation7 + $0x2f0] sm:$0xff]  }
 0x17f   :  { %3820 = vmatprep.subr.bf16.mxu1 %v5480_v62 }
 0x180   :  { %3841 = vmatpush3.bf16.msra.mxu0 %v4151_v37  ;;  %v4201_v37 = vld [vmem:[#allocation7 + $0x2e8] sm:$0xff]  }
 0x181   :  { %3842 = vmatprep.subr.bf16.mxu0 %v5480_v62 }
 0x182   :  { %3821 = vmatpush3.bf16.msra.mxu1 %v4152_v9  ;;  %v4202_v9 = vld [vmem:[#allocation7 + $0x2a8] sm:$0xff]  }
 0x183   :  { %3822 = vmatprep.subr.bf16.mxu1 %v5480_v62 }
 0x184   :  { %3843 = vmatpush3.bf16.msra.mxu0 %v4153_v39  ;;  %v4203_v39 = vld [vmem:[#allocation7 + $0x2e0] sm:$0xff]  }
 0x185   :  { %3844 = vmatprep.subr.bf16.mxu0 %v5480_v62 }
 0x186   :  { %3823 = vmatpush3.bf16.msra.mxu1 %v4154_v40  ;;  %v4204_v40 = vld [vmem:[#allocation7 + $0x2a0] sm:$0xff]  }
 0x187   :  { %3824 = vmatprep.subr.bf16.mxu1 %v5480_v62 }
 0x188   :  { %3845 = vmatpush3.bf16.msra.mxu0 %v4155_v61  ;;  %v4205_v61 = vld [vmem:[#allocation7 + $0x2d8] sm:$0xff]  }
 0x189   :  { %3846 = vmatprep.subr.bf16.mxu0 %v5480_v62 }
 0x18a   :  { %3825 = vmatpush3.bf16.msra.mxu1 %v4156_v16  ;;  %v4207_v16 = vld [vmem:[#allocation7 + $0x2d0] sm:$0xff]  }
 0x18b   :  { %3826 = vmatprep.subr.bf16.mxu1 %v5480_v62 }
 0x18c   :  { %3847 = vmatpush3.bf16.msra.mxu0 %v4157_v17  ;;  %v4208_v17 = vld [vmem:[#allocation7 + $0x290] sm:$0xff]  }
 0x18d   :  { %3848 = vmatprep.subr.bf16.mxu0 %v5480_v62 }
 0x18e   :  { %3827 = vmatpush3.bf16.msra.mxu1 %v4158_v29  ;;  %v4210_v29 = vld [vmem:[#allocation7 + $0x288] sm:$0xff]  }
 0x18f   :  { %3828 = vmatprep.subr.bf16.mxu1 %v5480_v62 }
 0x190   :  { %3849 = vmatpush3.bf16.msra.mxu0 %v4159_v19  ;;  %v4211_v19 = vld [vmem:[#allocation7 + $0x2c0] sm:$0xff]  }
 0x191   :  { %3850 = vmatprep.subr.bf16.mxu0 %v5480_v62 }
 0x192   :  { %3829 = vmatpush3.bf16.msra.mxu1 %v4160_v50  ;;  %v4213_v50 = vld [vmem:[#allocation7 + $0x378] sm:$0xff]  }
 0x193   :  { %3830 = vmatprep.subr.bf16.mxu1 %v5480_v62 }
 0x194   :  { %3851 = vmatpush3.bf16.msra.mxu0 %v4161_v55  ;;  %v1935_v55 = vrot.slane %v5128_v60, 3 }
 0x195   :  { %3852 = vmatprep.subr.bf16.mxu0 %v5480_v62 }
 0x196   :  { %3831 = vmatpush3.bf16.msra.mxu1 %v4162_v33  ;;  %v1827_v33 = vrot.slane %v5128_v60, 2 }
 0x197   :  { %3832 = vmatprep.subr.bf16.mxu1 %v5480_v62 }
 0x198   :  { %3853 = vmatpush3.bf16.msra.mxu0 %v4163_v53  ;;  %v4215_v53 = vld [vmem:[#allocation7 + $0x370] sm:$0xff]  }
 0x199   :  { %3878 = vmatprep.subr.bf16.mxu0 %v5480_v62 }
 0x19a   :  { %3833 = vmatpush3.bf16.msra.mxu1 %v4164_v44  ;;  %v4217_v44 = vld [vmem:[#allocation7 + $0x368] sm:$0xff]  }
 0x19b   :  { %3855 = vmatmul.mubr.bf16.vlgmr.msra.gmra.mxu0 %v1287_v56  ;;  %3858 = vmatprep.subr.bf16.mxu1 %v5480_v62  ;;  %v4219_v56 = vld [vmem:[#allocation7 + $0x360] sm:$0xff]  }
 0x19c   :  { %3879 = vmatpush3.bf16.msra.mxu0 %v4165_v54  ;;  %3894 = vmatprep.mubr.msk.bf16.mxu0 %vm4412_vm0, %v5480_v62  ;;  %v4218_v54 = vld [vmem:[#allocation7 + $0x328] sm:$0xff]  }
 0x19d   :  { %3835 = vmatmul.mubr.bf16.vlgmr.msra.gmra.mxu1 %v5081_v4  ;;  %3880 = vmatprep.subr.bf16.mxu0 %v5480_v62  ;;  %v4216_v4 = vld [vmem:[#allocation7 + $0x330] sm:$0xff]  }
 0x19e   :  { %3859 = vmatpush3.bf16.msra.mxu1 %v4166_v20  ;;  %3874 = vmatprep.mubr.msk.bf16.mxu1 %vm4412_vm0, %v5480_v62  ;;  %v4220_v20 = vld [vmem:[#allocation7 + $0x320] sm:$0xff]  }
 0x19f   :  { %3860 = vmatprep.subr.bf16.mxu1 %v5480_v62 }
 0x1a0   :  { %3881 = vmatpush3.bf16.msra.mxu0 %v4167_v23  ;;  %v4221_v23 = vld [vmem:[#allocation7 + $0x358] sm:$0xff]  }
 0x1a1   :  { %3882 = vmatprep.subr.bf16.mxu0 %v5480_v62 }
 0x1a2   :  { %3861 = vmatpush3.bf16.msra.mxu1 %v4168_v57  ;;  %v4222_v57 = vld [vmem:[#allocation7 + $0x318] sm:$0xff]  }
 0x1a3   :  { %3862 = vmatprep.subr.bf16.mxu1 %v5480_v62 }
 0x1a4   :  { %3883 = vmatpush3.bf16.msra.mxu0 %v4169_v58  ;;  %v4223_v58 = vld [vmem:[#allocation7 + $0x350] sm:$0xff]  }
 0x1a5   :  { %3884 = vmatprep.subr.bf16.mxu0 %v5480_v62 }
 0x1a6   :  { %3863 = vmatpush3.bf16.msra.mxu1 %v4170_v38  ;;  %v4224_v38 = vld [vmem:[#allocation7 + $0x310] sm:$0xff]  }
 0x1a7   :  { %3864 = vmatprep.subr.bf16.mxu1 %v5480_v62 }
 0x1a8   :  { %3885 = vmatpush3.bf16.msra.mxu0 %v4171_v1  ;;  %v4225_v1 = vld [vmem:[#allocation7 + $0x348] sm:$0xff]  }
 0x1a9   :  { %3886 = vmatprep.subr.bf16.mxu0 %v5480_v62 }
 0x1aa   :  { %3865 = vmatpush3.bf16.msra.mxu1 %v4172_v31  ;;  %v732_v31 = vmax.f32 %v5041_v49, 0.0 }
 0x1ab   :  { %3866 = vmatprep.subr.bf16.mxu1 %v5480_v62 }
 0x1ac   :  { %3887 = vmatpush3.bf16.msra.mxu0 %v4173_v3  ;;  %v4226_v3 = vld [vmem:[#allocation7 + $0x308] sm:$0xff]  }
 0x1ad   :  { %3888 = vmatprep.subr.bf16.mxu0 %v5480_v62 }
 0x1ae   :  { %3867 = vmatpush3.bf16.msra.mxu1 %v4174_v27  ;;  %v4227_v27 = vld [vmem:[#allocation7 + $0x340] sm:$0xff]  }
 0x1af   :  { %3868 = vmatprep.subr.bf16.mxu1 %v5480_v62 }
 0x1b0   :  { %3889 = vmatpush3.bf16.msra.mxu0 %v4175_v6  ;;  %v5175_v6 = vpack.c.bf16 %v732_v31, %v732_v31 }
 0x1b1   :  { %3890 = vmatprep.subr.bf16.mxu0 %v5480_v62 }
 0x1b2   :  { %3869 = vmatpush3.bf16.msra.mxu1 %v4176_v41  ;;  %v4228_v41 = vld [vmem:[#allocation7 + $0x300] sm:$0xff]   ;;  %v2151_v49 = vrot.slane %v5175_v6, 1 }
 0x1b3   :  { %3870 = vmatprep.subr.bf16.mxu1 %v5480_v62 }
 0x1b4   :  { %3891 = vmatpush3.bf16.msra.mxu0 %v4177_v8  ;;  %v4229_v8 = vld [vmem:[#allocation7 + $0x3f8] sm:$0xff]  }
 0x1b5   :  { %3892 = vmatprep.subr.bf16.mxu0 %v5480_v62 }
 0x1b6   :  { %3871 = vmatpush3.bf16.msra.mxu1 %v4178_v2  ;;  %v4230_v2 = vld [vmem:[#allocation7 + $0x3b8] sm:$0xff]  }
 0x1b7   :  { %3872 = vmatprep.subr.bf16.mxu1 %v5480_v62 }
 0x1b8   :  { %3893 = vmatpush3.bf16.msra.mxu0 %v4179_v12 }
 0x1b9   :  { %3918 = vmatprep.subr.bf16.mxu0 %v5480_v62 }
 0x1ba   :  { %3873 = vmatpush3.bf16.msra.mxu1 %v4180_v10  ;;  %v4231_v10 = vld [vmem:[#allocation7 + $0x3f0] sm:$0xff]  }
 0x1bb   :  { %3895 = vmatmul.mubr.bf16.vlgmr.msra.gmra.mxu0 %v1503_v25  ;;  %3898 = vmatprep.subr.bf16.mxu1 %v5480_v62 }
 0x1bc   :  { %3919 = vmatpush3.bf16.msra.mxu0 %v4181_v63  ;;  %3934 = vmatprep.mubr.msk.bf16.mxu0 %vm4412_vm0, %v5480_v62 }
 0x1bd   :  { %3875 = vmatmul.mubr.bf16.vlgmr.msra.gmra.mxu1 %v1395_v42  ;;  %3920 = vmatprep.subr.bf16.mxu0 %v5480_v62  ;;  %v4232_v42 = vld [vmem:[#allocation7 + $0x3b0] sm:$0xff]  }
 0x1be   :  { %3899 = vmatpush3.bf16.msra.mxu1 %v4182_v36  ;;  %3914 = vmatprep.mubr.msk.bf16.mxu1 %vm4412_vm0, %v5480_v62 }
 0x1bf   :  { %3900 = vmatprep.subr.bf16.mxu1 %v5480_v62 }
 0x1c0   :  { %3921 = vmatpush3.bf16.msra.mxu0 %v4183_v34 }
 0x1c1   :  { %3922 = vmatprep.subr.bf16.mxu0 %v5480_v62 }
 0x1c2   :  { %3901 = vmatpush3.bf16.msra.mxu1 %v4184_v47 }
 0x1c3   :  { %3902 = vmatprep.subr.bf16.mxu1 %v5480_v62 }
 0x1c4   :  { %3923 = vmatpush3.bf16.msra.mxu0 %v4185_v0  ;;  %v4233_v0 = vld [vmem:[#allocation7 + $0x3e8] sm:$0xff]  }
 0x1c5   :  { %3924 = vmatprep.subr.bf16.mxu0 %v5480_v62 }
 0x1c6   :  { %3903 = vmatpush3.bf16.msra.mxu1 %v4186_v11 }
 0x1c7   :  { %3904 = vmatprep.subr.bf16.mxu1 %v5480_v62 }
 0x1c8   :  { %3925 = vmatpush3.bf16.msra.mxu0 %v4187_v26 }
 0x1c9   :  { %3926 = vmatprep.subr.bf16.mxu0 %v5480_v62 }
 0x1ca   :  { %3905 = vmatpush3.bf16.msra.mxu1 %v4188_v5  ;;  %v4234_v5 = vld [vmem:[#allocation7 + $0x3a8] sm:$0xff]  }
 0x1cb   :  { %3906 = vmatprep.subr.bf16.mxu1 %v5480_v62 }
 0x1cc   :  { %3927 = vmatpush3.bf16.msra.mxu0 %v4189_v45 }
 0x1cd   :  { %3928 = vmatprep.subr.bf16.mxu0 %v5480_v62 }
 0x1ce   :  { %3907 = vmatpush3.bf16.msra.mxu1 %v4190_v13  ;;  %v4235_v13 = vld [vmem:[#allocation7 + $0x3e0] sm:$0xff]  }
 0x1cf   :  { %3908 = vmatprep.subr.bf16.mxu1 %v5480_v62 }
 0x1d0   :  { %3929 = vmatpush3.bf16.msra.mxu0 %v4191_v14  ;;  %v4236_v14 = vld [vmem:[#allocation7 + $0x3a0] sm:$0xff]  }
 0x1d1   :  { %3930 = vmatprep.subr.bf16.mxu0 %v5480_v62 }
 0x1d2   :  { %3909 = vmatpush3.bf16.msra.mxu1 %v4192_v15  ;;  %v4237_v15 = vld [vmem:[#allocation7 + $0x3d8] sm:$0xff]  }
 0x1d3   :  { %3910 = vmatprep.subr.bf16.mxu1 %v5480_v62 }
 0x1d4   :  { %3931 = vmatpush3.bf16.msra.mxu0 %v4193_v24  ;;  %v2467_v24 = vld [vmem:[%s5468_s6] sm:$0xff] }
 0x1d5   :  { %3932 = vmatprep.subr.bf16.mxu0 %v5480_v62 }
 0x1d6   :  { %3911 = vmatpush3.bf16.msra.mxu1 %v4194_v18  ;;  %v4239_v18 = vld [vmem:[#allocation7 + $0x3d0] sm:$0xff]  }
 0x1d7   :  { %3912 = vmatprep.subr.bf16.mxu1 %v5480_v62 }
 0x1d8   :  { %3933 = vmatpush3.bf16.msra.mxu0 %v4195_v32  ;;  %v2471_v32 = vcombine.high %v2467_v24, %v2467_v24 }
 0x1d9   :  { %3958 = vmatprep.subr.bf16.mxu0 %v5480_v62 }
 0x1da   :  { %3913 = vmatpush3.bf16.msra.mxu1 %v4196_v43  ;;  %v4241_v43 = vld [vmem:[#allocation7 + $0x3c8] sm:$0xff]  }
 0x1db   :  { %3935 = vmatmul.mubr.bf16.vlgmr.msra.gmra.mxu0 %v1719_v59  ;;  %3938 = vmatprep.subr.bf16.mxu1 %v5480_v62  ;;  %v4242_v59 = vld [vmem:[#allocation7 + $0x388] sm:$0xff]  }
 0x1dc   :  { %3959 = vmatpush3.bf16.msra.mxu0 %v4197_v35  ;;  %3974 = vmatprep.mubr.msk.bf16.mxu0 %vm4412_vm0, %v5480_v62  ;;  %v5203_v35 = vrot.slane %v2471_v32, %v4559_v30 }
 0x1dd   :  { %3915 = vmatmul.mubr.bf16.vlgmr.msra.gmra.mxu1 %v5128_v60  ;;  %3960 = vmatprep.subr.bf16.mxu0 %v5480_v62  ;;  %v4240_v60 = vld [vmem:[#allocation7 + $0x390] sm:$0xff]  }
 0x1de   :  { %3939 = vmatpush3.bf16.msra.mxu1 %v4198_v28  ;;  %3954 = vmatprep.mubr.msk.bf16.mxu1 %vm4412_vm0, %v5480_v62  ;;  %v5207_v28 = vrot.slane %v2467_v24, %v4559_v30  ;;  %v4245_v30 = vld [vmem:[%s5469_s7 + $0x78] sm:$0xff]  }
 0x1df   :  { %3940 = vmatprep.subr.bf16.mxu1 %v5480_v62 }
 0x1e0   :  { %3961 = vmatpush3.bf16.msra.mxu0 %v4199_v21  ;;  %v4243_v21 = vld [vmem:[#allocation7 + $0x3c0] sm:$0xff]   ;;  %v2502_v24 = vpack.c.bf16 %v5207_v28, %v5207_v28 }
 0x1e1   :  { %3962 = vmatprep.subr.bf16.mxu0 %v5480_v62 }
 0x1e2   :  { %3941 = vmatpush3.bf16.msra.mxu1 %v4200_v22  ;;  %v2487_v22 = vcombine.high %v5203_v35, %v5203_v35 }
 0x1e3   :  { %3942 = vmatprep.subr.bf16.mxu1 %v5480_v62 }
 0x1e4   :  { %3963 = vmatpush3.bf16.msra.mxu0 %v4201_v37  ;;  %v4247_v37 = vld [vmem:[%s5469_s7 + $0xf8] sm:$0xff]  }
 0x1e5   :  { %3964 = vmatprep.subr.bf16.mxu0 %v5480_v62 }
 0x1e6   :  { %3943 = vmatpush3.bf16.msra.mxu1 %v4202_v9  ;;  %v4244_v9 = vld [vmem:[#allocation7 + $0x380] sm:$0xff]  }
 0x1e7   :  { %3944 = vmatprep.subr.bf16.mxu1 %v5480_v62 }
 0x1e8   :  { %3965 = vmatpush3.bf16.msra.mxu0 %v4203_v39  ;;  %v2486_v39 = vcombine.high %v5207_v28, %v5207_v28  ;;  %v4281_v28 = vld [vmem:[%s5469_s7 + $0x130] sm:$0xff]  }
 0x1e9   :  { %3966 = vmatprep.subr.bf16.mxu0 %v5480_v62 }
 0x1ea   :  { %3945 = vmatpush3.bf16.msra.mxu1 %v4204_v40  ;;  %v4248_v40 = vld [vmem:[%s5469_s7 + $0xb8] sm:$0xff]  }
 0x1eb   :  { %3946 = vmatprep.subr.bf16.mxu1 %v5480_v62 }
 0x1ec   :  { %3967 = vmatpush3.bf16.msra.mxu0 %v4205_v61  ;;  %v2505_v61 = vpack.c.bf16 %v2487_v22, %v2487_v22 }
 0x1ed   :  { %3968 = vmatprep.subr.bf16.mxu0 %v5480_v62 }
 0x1ee   :  { %3947 = vmatpush3.bf16.msra.mxu1 %v4206_v46  ;;  %v2367_v46 = vrot.slane %v5175_v6, 3 }
 0x1ef   :  { %3948 = vmatprep.subr.bf16.mxu1 %v5480_v62 }
 0x1f0   :  { %3969 = vmatpush3.bf16.msra.mxu0 %v4207_v16  ;;  %v4251_v16 = vld [vmem:[%s5469_s7 + $0xf0] sm:$0xff]  }
 0x1f1   :  { %3970 = vmatprep.subr.bf16.mxu0 %v5480_v62 }
 0x1f2   :  { %3949 = vmatpush3.bf16.msra.mxu1 %v4208_v17  ;;  %v4246_v17 = vld [vmem:[%s5469_s7 + $0x38] sm:$0xff]  }
 0x1f3   :  { %3950 = vmatprep.subr.bf16.mxu1 %v5480_v62 }
 0x1f4   :  { %3971 = vmatpush3.bf16.msra.mxu0 %v4209_v48  ;;  %v2503_v48 = vpack.c.bf16 %v2486_v39, %v2486_v39 }
 0x1f5   :  { %3972 = vmatprep.subr.bf16.mxu0 %v5480_v62 }
 0x1f6   :  { %3951 = vmatpush3.bf16.msra.mxu1 %v4210_v29 }
 0x1f7   :  { %3952 = vmatprep.subr.bf16.mxu1 %v5480_v62 }
 0x1f8   :  { %3973 = vmatpush3.bf16.msra.mxu0 %v4211_v19  ;;  %v2259_v19 = vrot.slane %v5175_v6, 2 }
 0x1f9   :  { %3998 = vmatprep.subr.bf16.mxu0 %v5480_v62 }
 0x1fa   :  { %3953 = vmatpush3.bf16.msra.mxu1 %v4212_v51  ;;  %v4249_v51 = vld [vmem:[%s5469_s7 + $0x70] sm:$0xff]  }
 0x1fb   :  { %3975 = vmatmul.mubr.bf16.vlgmr.msra.gmra.mxu0 %v1935_v55  ;;  %3978 = vmatprep.subr.bf16.mxu1 %v5480_v62 }
 0x1fc   :  { %3999 = vmatpush3.bf16.msra.mxu0 %v4213_v50  ;;  %4014 = vmatprep.mubr.msk.bf16.mxu0 %vm4412_vm0, %v5480_v62  ;;  %v4252_v50 = vld [vmem:[%s5469_s7 + $0xb0] sm:$0xff]  }
 0x1fd   :  { %3955 = vmatmul.mubr.bf16.vlgmr.msra.gmra.mxu1 %v1827_v33  ;;  %4000 = vmatprep.subr.bf16.mxu0 %v5480_v62  ;;  %v4255_v33 = vld [vmem:[%s5469_s7 + $0xe8] sm:$0xff]  }
 0x1fe   :  { %3979 = vmatpush3.bf16.msra.mxu1 %v4214_v52  ;;  %3994 = vmatprep.mubr.msk.bf16.mxu1 %vm4412_vm0, %v5480_v62 }
 0x1ff   :  { %3980 = vmatprep.subr.bf16.mxu1 %v5480_v62 }
 0x200   :  { %4001 = vmatpush3.bf16.msra.mxu0 %v4215_v53 }
 0x201   :  { %4002 = vmatprep.subr.bf16.mxu0 %v5480_v62 }
 0x202   :  { %3981 = vmatpush3.bf16.msra.mxu1 %v4216_v4  ;;  %v4250_v4 = vld [vmem:[%s5469_s7 + $0x30] sm:$0xff]  }
 0x203   :  { %3982 = vmatprep.subr.bf16.mxu1 %v5480_v62 }
 0x204   :  { %4003 = vmatpush3.bf16.msra.mxu0 %v4217_v44 }
 0x205   :  { %4004 = vmatprep.subr.bf16.mxu0 %v5480_v62 }
 0x206   :  { %3983 = vmatpush3.bf16.msra.mxu1 %v4218_v54 }
 0x207   :  { %3984 = vmatprep.subr.bf16.mxu1 %v5480_v62 }
 0x208   :  { %4005 = vmatpush3.bf16.msra.mxu0 %v4219_v56  ;;  %v4253_v56 = vld [vmem:[%s5469_s7 + $0x68] sm:$0xff]  }
 0x209   :  { %4006 = vmatprep.subr.bf16.mxu0 %v5480_v62 }
 0x20a   :  { %3985 = vmatpush3.bf16.msra.mxu1 %v4220_v20  ;;  %v4256_v20 = vld [vmem:[%s5469_s7 + $0xa8] sm:$0xff]  }
 0x20b   :  { %3986 = vmatprep.subr.bf16.mxu1 %v5480_v62 }
 0x20c   :  { %4007 = vmatpush3.bf16.msra.mxu0 %v4221_v23 }
 0x20d   :  { %4008 = vmatprep.subr.bf16.mxu0 %v5480_v62 }
 0x20e   :  { %3987 = vmatpush3.bf16.msra.mxu1 %v4222_v57 }
 0x20f   :  { %3988 = vmatprep.subr.bf16.mxu1 %v5480_v62 }
 0x210   :  { %4009 = vmatpush3.bf16.msra.mxu0 %v4223_v58 }
 0x211   :  { %4010 = vmatprep.subr.bf16.mxu0 %v5480_v62 }
 0x212   :  { %3989 = vmatpush3.bf16.msra.mxu1 %v4224_v38  ;;  %v4259_v38 = vld [vmem:[%s5469_s7 + $0xe0] sm:$0xff]  }
 0x213   :  { %3990 = vmatprep.subr.bf16.mxu1 %v5480_v62 }
 0x214   :  { %4011 = vmatpush3.bf16.msra.mxu0 %v4225_v1  ;;  %v4254_v1 = vld [vmem:[%s5469_s7 + $0x28] sm:$0xff]  }
 0x215   :  { %4012 = vmatprep.subr.bf16.mxu0 %v5480_v62 }
 0x216   :  { %3991 = vmatpush3.bf16.msra.mxu1 %v4226_v3  ;;  %v4257_v3 = vld [vmem:[%s5469_s7 + $0x60] sm:$0xff]  }
 0x217   :  { %3992 = vmatprep.subr.bf16.mxu1 %v5480_v62 }
 0x218   :  { %4013 = vmatpush3.bf16.msra.mxu0 %v4227_v27  ;;  %v4260_v27 = vld [vmem:[%s5469_s7 + $0xa0] sm:$0xff]  }
 0x219   :  { %4038 = vmatprep.subr.bf16.mxu0 %v5480_v62 }
 0x21a   :  { %3993 = vmatpush3.bf16.msra.mxu1 %v4228_v41  ;;  %v4258_v41 = vld [vmem:[%s5469_s7 + $0x20] sm:$0xff]  }
 0x21b   :  { %4015 = vmatmul.mubr.bf16.vlgmr.msra.gmra.mxu0 %v2151_v49  ;;  %v940_v12 = vpop.f32.mrf.mxu0  ;;  %4018 = vmatprep.subr.bf16.mxu1 %v5480_v62  ;;  %v4264_v49 = vld [vmem:[%s5469_s7 + $0x98] sm:$0xff]  }
 0x21c   :  { %4039 = vmatpush3.bf16.msra.mxu0 %v4229_v8  ;;  %4054 = vmatprep.mubr.msk.bf16.mxu0 %vm4412_vm0, %v5480_v62  ;;  %v4261_v8 = vld [vmem:[%s5469_s7 + $0x58] sm:$0xff]  }
 0x21d   :  { %3995 = vmatmul.mubr.bf16.vlgmr.msra.gmra.mxu1 %v5175_v6  ;;  %v852_v63 = vpop.f32.mrf.mxu1  ;;  %v3776_v25 = vpop.f32.mrf.mxu0  ;;  %4040 = vmatprep.subr.bf16.mxu0 %v5480_v62  ;;  %v4263_v6 = vld [vmem:[%s5469_s7 + $0xd8] sm:$0xff]  }
 0x21e   :  { %v5186_v36 = vadd.f32 %v940_v12, %v852_v63  ;;  %4019 = vmatpush3.bf16.msra.mxu1 %v4230_v2  ;;  %4034 = vmatprep.mubr.msk.bf16.mxu1 %vm4412_vm0, %v5480_v62  ;;  %v4267_v2 = vld [vmem:[%s5469_s7 + $0xd0] sm:$0xff]   ;;  %v4262_v12 = vld [vmem:[%s5469_s7 + $0x18] sm:$0xff]   ;;  %v4271_v25 = vld [vmem:[%s5469_s7 + $0xc8] sm:$0xff]  }
 0x21f   :  { %v3756_v34 = vpop.f32.mrf.mxu1  ;;  %v943_v47 = vpop.f32.mrf.mxu0  ;;  %4020 = vmatprep.subr.bf16.mxu1 %v5480_v62  ;;  %v4268_v63 = vld [vmem:[%s5469_s7 + $0x90] sm:$0xff]  }
 0x220   :  { %4041 = vmatpush3.bf16.msra.mxu0 %v4231_v10  ;;  %v4265_v10 = vld [vmem:[%s5469_s7 + $0x50] sm:$0xff]   ;;  %v4272_v34 = vld [vmem:[%s5469_s7 + $0x88] sm:$0xff]   ;;  %v4275_v47 = vld [vmem:[%s5469_s7 + $0xc0] sm:$0xff]  }
 0x221   :  { %v855_v11 = vpop.f32.mrf.mxu1  ;;  %v3777_v26 = vpop.f32.mrf.mxu0  ;;  %4042 = vmatprep.subr.bf16.mxu0 %v5480_v62 }
 0x222   :  { %4021 = vmatpush3.bf16.msra.mxu1 %v4232_v42  ;;  %v4269_v42 = vld [vmem:[%s5469_s7 + $0x48] sm:$0xff]   ;;  %v4273_v11 = vld [vmem:[%s5469_s7 + $0x40] sm:$0xff]  }
 0x223   :  { %v3757_v45 = vpop.f32.mrf.mxu1  ;;  %4022 = vmatprep.subr.bf16.mxu1 %v5480_v62  ;;  %v5314_v26 = vld.sshfl [vmem:[%s5468_s6 + $0x8] sm:$0x33 pattern:$0x76325410] }
 0x224   :  { %4043 = vmatpush3.bf16.msra.mxu0 %v4233_v0  ;;  %v4270_v0 = vld [vmem:[%s5469_s7 + $0x8] sm:$0xff]   ;;  %v4274_v45 = vld [vmem:[%s5469_s7] sm:$0xff]  }
 0x225   :  { %4044 = vmatprep.subr.bf16.mxu0 %v5480_v62 }
 0x226   :  { %4023 = vmatpush3.bf16.msra.mxu1 %v4234_v5  ;;  %v4276_v5 = vld [vmem:[%s5469_s7 + $0x80] sm:$0xff]  }
 0x227   :  { %4024 = vmatprep.subr.bf16.mxu1 %v5480_v62 }
 0x228   :  { %4045 = vmatpush3.bf16.msra.mxu0 %v4235_v13  ;;  %v2495_v13 = vcombine.high %v5314_v26, %v5314_v26 }
 0x229   :  { %4046 = vmatprep.subr.bf16.mxu0 %v5480_v62 }
 0x22a   :  { %4025 = vmatpush3.bf16.msra.mxu1 %v4236_v14  ;;  %v4277_v14 = vld [vmem:[%s5469_s7 + $0x178] sm:$0xff]  }
 0x22b   :  { %4026 = vmatprep.subr.bf16.mxu1 %v5480_v62 }
 0x22c   :  { %4047 = vmatpush3.bf16.msra.mxu0 %v4237_v15  ;;  %v2504_v15 = vpack.c.bf16 %v5203_v35, %v5203_v35 }
 0x22d   :  { %4048 = vmatprep.subr.bf16.mxu0 %v5480_v62 }
 0x22e   :  { %4027 = vmatpush3.bf16.msra.mxu1 %v4238_v7  ;;  %v4279_v7 = vld [vmem:[%s5469_s7 + $0x138] sm:$0xff]  }
 0x22f   :  { %4028 = vmatprep.subr.bf16.mxu1 %v5480_v62 }
 0x230   :  { %4049 = vmatpush3.bf16.msra.mxu0 %v4239_v18  ;;  %v2507_v18 = vpack.c.bf16 %v2495_v13, %v2495_v13 }
 0x231   :  { %4050 = vmatprep.subr.bf16.mxu0 %v5480_v62 }
 0x232   :  { %4029 = vmatpush3.bf16.msra.mxu1 %v4240_v60  ;;  %v4280_v60 = vld [vmem:[%s5469_s7 + $0x170] sm:$0xff]  }
 0x233   :  { %4030 = vmatprep.subr.bf16.mxu1 %v5480_v62 }
 0x234   :  { %4051 = vmatpush3.bf16.msra.mxu0 %v4241_v43 }
 0x235   :  { %4052 = vmatprep.subr.bf16.mxu0 %v5480_v62 }
 0x236   :  { %4031 = vmatpush3.bf16.msra.mxu1 %v4242_v59 }
 0x237   :  { %4032 = vmatprep.subr.bf16.mxu1 %v5480_v62 }
 0x238   :  { %4053 = vmatpush3.bf16.msra.mxu0 %v4243_v21 }
 0x239   :  { %3656 = vmatprep.subr.bf16.mxu0 %v4247_v37  ;;  %v4282_v37 = vld [vmem:[%s5469_s7 + $0x168] sm:$0xff]  }
 0x23a   :  { %4033 = vmatpush3.bf16.msra.mxu1 %v4244_v9 }
 0x23b   :  { %v1155_v29 = vpop.f32.mrf.mxu0  ;;  %4055 = vmatmul.mubr.bf16.vlgmr.msra.gmra.mxu0 %v2367_v46  ;;  %3634 = vmatprep.subr.bf16.mxu1 %v4245_v30  ;;  %v4284_v46 = vld [vmem:[%s5469_s7 + $0x160] sm:$0xff]  }
 0x23c   :  { %3657 = vmatpush3.bf16.msra.mxu0 %v4248_v40  ;;  %2971 = vmatprep.mubr.bf16.mxu0 %v2505_v61  ;;  %v4283_v40 = vld [vmem:[%s5469_s7 + $0x128] sm:$0xff]  }
 0x23d   :  { %v1047_v55 = vpop.f32.mrf.mxu1  ;;  %v3816_v52 = vpop.f32.mrf.mxu0  ;;  %4035 = vmatmul.mubr.bf16.vlgmr.msra.gmra.mxu1 %v2259_v19  ;;  %3658 = vmatprep.subr.bf16.mxu0 %v4251_v16  ;;  %v4285_v16 = vld [vmem:[%s5469_s7 + $0x120] sm:$0xff]   ;;  %v4289_v19 = vld [vmem:[%s5469_s7 + $0x110] sm:$0xff]  }
 0x23e   :  { %v1053_v53 = vadd.f32 %v1047_v55, %v5186_v36  ;;  %3635 = vmatpush3.bf16.msra.mxu1 %v4246_v17  ;;  %2931 = vmatprep.mubr.bf16.mxu1 %v2503_v48  ;;  %v4266_v36 = vld [vmem:[%s5469_s7 + $0x10] sm:$0xff]   ;;  %v4286_v17 = vld [vmem:[%s5469_s7 + $0x158] sm:$0xff]   ;;  %v4292_v55 = vld [vmem:[%s5469_s7 + $0x140] sm:$0xff]  }
 0x23f   :  { %v3796_v44 = vpop.f32.mrf.mxu1  ;;  %v1158_v54 = vpop.f32.mrf.mxu0  ;;  %3636 = vmatprep.subr.bf16.mxu1 %v4249_v51  ;;  %v4287_v48 = vld [vmem:[%s5469_s7 + $0x118] sm:$0xff]   ;;  %v4290_v51 = vld [vmem:[%s5469_s7 + $0x148] sm:$0xff]   ;;  %v4293_v52 = vld [vmem:[%s5469_s7 + $0x100] sm:$0xff]  }
 0x240   :  { %3659 = vmatpush3.bf16.msra.mxu0 %v4252_v50  ;;  %v5252_v23 = vadd.f32 %v1155_v29, %v1053_v53  ;;  %v4288_v29 = vld [vmem:[%s5469_s7 + $0x150] sm:$0xff]   ;;  %v4291_v50 = vld [vmem:[%s5469_s7 + $0x108] sm:$0xff]   ;;  %v4294_v53 = vld [vmem:[%s5471_s9 + $0x38] sm:$0xff]  }
 0x241   :  { %v1050_v57 = vpop.f32.mrf.mxu1  ;;  %v3817_v58 = vpop.f32.mrf.mxu0  ;;  %3660 = vmatprep.subr.bf16.mxu0 %v4255_v33  ;;  %v2506_v33 = vpack.c.bf16 %v5314_v26, %v5314_v26  ;;  %v4303_v26 = vld [vmem:[%s5472_s10 + $0x30] sm:$0xff]  }
 0x242   :  { %3637 = vmatpush3.bf16.msra.mxu1 %v4250_v4 }
 0x243   :  { %v3797_v31 = vpop.f32.mrf.mxu1  ;;  %3638 = vmatprep.subr.bf16.mxu1 %v4253_v56 }
 0x244   :  { %3661 = vmatpush3.bf16.msra.mxu0 %v4256_v20  ;;  %v4295_v20 = vld [vmem:[%s5471_s9 + $0x30] sm:$0xff]   ;;  %v4296_v31 = vld [vmem:[%s5471_s9 + $0x28] sm:$0xff]  }
 0x245   :  { %3662 = vmatprep.subr.bf16.mxu0 %v4259_v38 }
 0x246   :  { %3639 = vmatpush3.bf16.msra.mxu1 %v4254_v1 }
 0x247   :  { %3640 = vmatprep.subr.bf16.mxu1 %v4257_v3 }
 0x248   :  { %3663 = vmatpush3.bf16.msra.mxu0 %v4260_v27  ;;  %v4297_v27 = vld [vmem:[%s5471_s9 + $0x20] sm:$0xff]  }
 0x249   :  { %3664 = vmatprep.subr.bf16.mxu0 %v4263_v6  ;;  %v4298_v6 = vld [vmem:[%s5471_s9 + $0x18] sm:$0xff]  }
 0x24a   :  { %3641 = vmatpush3.bf16.msra.mxu1 %v4258_v41  ;;  %v4299_v41 = vld [vmem:[%s5471_s9 + $0x10] sm:$0xff]  }
 0x24b   :  { %3642 = vmatprep.subr.bf16.mxu1 %v4261_v8  ;;  %v4300_v8 = vld [vmem:[%s5471_s9 + $0x8] sm:$0xff]  }
 0x24c   :  { %3665 = vmatpush3.bf16.msra.mxu0 %v4264_v49  ;;  %v4301_v49 = vld [vmem:[%s5471_s9] sm:$0xff]  }
 0x24d   :  { %3666 = vmatprep.subr.bf16.mxu0 %v4267_v2 }
 0x24e   :  { %3643 = vmatpush3.bf16.msra.mxu1 %v4262_v12 }
 0x24f   :  { %3644 = vmatprep.subr.bf16.mxu1 %v4265_v10 }
 0x250   :  { %3667 = vmatpush3.bf16.msra.mxu0 %v4268_v63 }
 0x251   :  { %3668 = vmatprep.subr.bf16.mxu0 %v4271_v25 }
 0x252   :  { %3645 = vmatpush3.bf16.msra.mxu1 %v4266_v36 }
 0x253   :  { %3646 = vmatprep.subr.bf16.mxu1 %v4269_v42 }
 0x254   :  { %3669 = vmatpush3.bf16.msra.mxu0 %v4272_v34 }
 0x255   :  { %3670 = vmatprep.subr.bf16.mxu0 %v4275_v47 }
 0x256   :  { %3647 = vmatpush3.bf16.msra.mxu1 %v4270_v0 }
 0x257   :  { %3648 = vmatprep.subr.bf16.mxu1 %v4273_v11  ;;  %v4302_v11 = vld [vmem:[%s5472_s10 + $0x38] sm:$0xff]  }
 0x258   :  { %3671 = vmatpush3.bf16.msra.mxu0 %v4276_v5 }
 0x259   :  { %4058 = vmatprep.subr.bf16.mxu0 %v5480_v62 }
 0x25a   :  { %3649 = vmatpush3.bf16.msra.mxu1 %v4274_v45  ;;  %v4304_v45 = vld [vmem:[%s5472_s10 + $0x28] sm:$0xff]  }
 0x25b   :  { %v1371_v32 = vpop.f32.mrf.mxu0  ;;  %3678 = vmatprep.subr.bf16.mxu1 %v4277_v14  ;;  %2972 = vmatmul.mubr.bf16.vlgmr.msra.gmra.mxu0 %v2504_v15 }
 0x25c   :  { %4074 = vmatprep.mubr.msk.bf16.mxu0 %vm4412_vm0, %v5480_v62  ;;  %4059 = vmatpush3.bf16.msra.mxu0 %v4302_v11 }
 0x25d   :  { %v1262_v43 = vpop.f32.mrf.mxu1  ;;  %v3856_v35 = vpop.f32.mrf.mxu0  ;;  %2932 = vmatmul.mubr.bf16.vlgmr.msra.gmra.mxu1 %v2502_v24  ;;  %4060 = vmatprep.subr.bf16.mxu0 %v5480_v62 }
 0x25e   :  { %v1268_v59 = vadd.f32 %v1262_v43, %v5252_v23  ;;  %3679 = vmatpush3.bf16.msra.mxu1 %v4279_v7  ;;  %3011 = vmatprep.mubr.bf16.mxu1 %v2507_v18  ;;  %v4305_v7 = vld [vmem:[%s5472_s10 + $0x20] sm:$0xff]   ;;  %v4306_v43 = vld [vmem:[%s5472_s10 + $0x18] sm:$0xff]   ;;  %v4307_v35 = vld [vmem:[%s5472_s10 + $0x10] sm:$0xff]  }
 0x25f   :  { %v3836_v21 = vpop.f32.mrf.mxu1  ;;  %v1374_v22 = vpop.f32.mrf.mxu0  ;;  %3680 = vmatprep.subr.bf16.mxu1 %v4280_v60 }
 0x260   :  { %v1377_v9 = vadd.f32 %v1371_v32, %v1268_v59  ;;  %4061 = vmatpush3.bf16.msra.mxu0 %v4303_v26  ;;  %v4308_v59 = vld [vmem:[%s5472_s10 + $0x8] sm:$0xff]  }
 0x261   :  { %v1265_v39 = vpop.f32.mrf.mxu1  ;;  %v3857_v30 = vpop.f32.mrf.mxu0  ;;  %4062 = vmatprep.subr.bf16.mxu0 %v5480_v62 }
 0x262   :  { %3681 = vmatpush3.bf16.msra.mxu1 %v4281_v28  ;;  %v4309_v28 = vld [vmem:[%s5472_s10] sm:$0xff]  }
 0x263   :  { %v3837_v61 = vpop.f32.mrf.mxu1  ;;  %3682 = vmatprep.subr.bf16.mxu1 %v4282_v37 }
 0x264   :  { %4063 = vmatpush3.bf16.msra.mxu0 %v4304_v45 }
 0x265   :  { %4064 = vmatprep.subr.bf16.mxu0 %v5480_v62 }
 0x266   :  { %3683 = vmatpush3.bf16.msra.mxu1 %v4283_v40 }
 0x267   :  { %3684 = vmatprep.subr.bf16.mxu1 %v4284_v46 }
 0x268   :  { %4065 = vmatpush3.bf16.msra.mxu0 %v4305_v7 }
 0x269   :  { %4066 = vmatprep.subr.bf16.mxu0 %v5480_v62 }
 0x26a   :  { %3685 = vmatpush3.bf16.msra.mxu1 %v4285_v16 }
 0x26b   :  { %3686 = vmatprep.subr.bf16.mxu1 %v4286_v17 }
 0x26c   :  { %4067 = vmatpush3.bf16.msra.mxu0 %v4306_v43 }
 0x26d   :  { %4068 = vmatprep.subr.bf16.mxu0 %v5480_v62 }
 0x26e   :  { %3687 = vmatpush3.bf16.msra.mxu1 %v4287_v48 }
 0x26f   :  { %3688 = vmatprep.subr.bf16.mxu1 %v4288_v29 }
 0x270   :  { %4069 = vmatpush3.bf16.msra.mxu0 %v4307_v35 }
 0x271   :  { %4070 = vmatprep.subr.bf16.mxu0 %v5480_v62 }
 0x272   :  { %3689 = vmatpush3.bf16.msra.mxu1 %v4289_v19 }
 0x273   :  { %3690 = vmatprep.subr.bf16.mxu1 %v4290_v51 }
 0x274   :  { %4071 = vmatpush3.bf16.msra.mxu0 %v4308_v59 }
 0x275   :  { %4072 = vmatprep.subr.bf16.mxu0 %v5480_v62 }
 0x276   :  { %3691 = vmatpush3.bf16.msra.mxu1 %v4291_v50  ;;  %v3412_v50 = vld [vmem:[%s5467_s5] ss:$0 sm:$0xff] }
 0x277   :  { %3692 = vmatprep.subr.bf16.mxu1 %v4292_v55 }
 0x278   :  { %4073 = vmatpush3.bf16.msra.mxu0 %v4309_v28 }
 0x27a   :  { %3693 = vmatpush3.bf16.msra.mxu1 %v4293_v52 }
 0x27b   :  { %v1587_v4 = vpop.f32.mrf.mxu0  ;;  %4078 = vmatprep.subr.bf16.mxu1 %v5480_v62 }
 0x27d   :  { %v1479_v44 = vpop.f32.mrf.mxu1  ;;  %v3896_v54 = vpop.f32.mrf.mxu0  ;;  %3012 = vmatmul.mubr.bf16.vlgmr.msra.gmra.mxu1 %v2506_v33 }
 0x27e   :  { %v1485_v56 = vadd.f32 %v1479_v44, %v1377_v9  ;;  %4079 = vmatpush3.bf16.msra.mxu1 %v4294_v53  ;;  %4094 = vmatprep.mubr.msk.bf16.mxu1 %vm4412_vm0, %v5480_v62 }
 0x27f   :  { %v3876_v23 = vpop.f32.mrf.mxu1  ;;  %v1590_v57 = vpop.f32.mrf.mxu0  ;;  %4080 = vmatprep.subr.bf16.mxu1 %v5480_v62 }
 0x280   :  { %v1593_v58 = vadd.f32 %v1587_v4, %v1485_v56 }
 0x281   :  { %v1482_v38 = vpop.f32.mrf.mxu1  ;;  %v3897_v1 = vpop.f32.mrf.mxu0 }
 0x282   :  { %4081 = vmatpush3.bf16.msra.mxu1 %v4295_v20 }
 0x283   :  { %v3877_v3 = vpop.f32.mrf.mxu1  ;;  %4082 = vmatprep.subr.bf16.mxu1 %v5480_v62 }
 0x286   :  { %4083 = vmatpush3.bf16.msra.mxu1 %v4296_v31 }
 0x287   :  { %4084 = vmatprep.subr.bf16.mxu1 %v5480_v62 }
 0x28a   :  { %4085 = vmatpush3.bf16.msra.mxu1 %v4297_v27 }
 0x28b   :  { %4086 = vmatprep.subr.bf16.mxu1 %v5480_v62 }
 0x28e   :  { %4087 = vmatpush3.bf16.msra.mxu1 %v4298_v6 }
 0x28f   :  { %4088 = vmatprep.subr.bf16.mxu1 %v5480_v62 }
 0x292   :  { %4089 = vmatpush3.bf16.msra.mxu1 %v4299_v41  ;;  %v3414_v41 = vld [vmem:[%s5470_s8] ss:$0 sm:$0xff] }
 0x293   :  { %4090 = vmatprep.subr.bf16.mxu1 %v5480_v62 }
 0x296   :  { %4091 = vmatpush3.bf16.msra.mxu1 %v4300_v8 }
 0x297   :  { %4092 = vmatprep.subr.bf16.mxu1 %v5480_v62 }
 0x29a   :  { %4093 = vmatpush3.bf16.msra.mxu1 %v4301_v49 }
 0x29b   :  { %v1803_v2 = vpop.f32.mrf.mxu0 }
 0x29d   :  { %v1694_v12 = vpop.f32.mrf.mxu1  ;;  %v3936_v10 = vpop.f32.mrf.mxu0 }
 0x29e   :  { %v1700_v63 = vadd.f32 %v1694_v12, %v1593_v58 }
 0x29f   :  { %v3916_v25 = vpop.f32.mrf.mxu1  ;;  %v1806_v36 = vpop.f32.mrf.mxu0 }
 0x2a0   :  { %v1809_v42 = vadd.f32 %v1803_v2, %v1700_v63 }
 0x2a1   :  { %v1697_v34 = vpop.f32.mrf.mxu1  ;;  %v3937_v47 = vpop.f32.mrf.mxu0 }
 0x2a3   :  { %v3917_v0 = vpop.f32.mrf.mxu1 }
 0x2bb   :  { %v2019_v5 = vpop.f32.mrf.mxu0 }
 0x2bd   :  { %v1911_v13 = vpop.f32.mrf.mxu1  ;;  %v3976_v14 = vpop.f32.mrf.mxu0 }
 0x2be   :  { %v1917_v46 = vadd.f32 %v1911_v13, %v1809_v42  ;;  %v3479_v13 = vld [vmem:[%s5473_s11] ss:$0 sm:$0xff]  ;;  %s4413_s11 = smov [#allocation8]  }
 0x2bf   :  { %v3956_v15 = vpop.f32.mrf.mxu1  ;;  %v2022_v24 = vpop.f32.mrf.mxu0  ;;  %s3257_s23 = sshll.u32 %s4413_s11, 4  ;;  %s3258_s23 = int_to_ptr.vmem [resolvable:$true] %s3257_s23 }
 0x2c0   :  { %v2025_v16 = vadd.f32 %v2019_v5, %v1917_v46  ;;  %s4377_s24 = scalar_lea.vmem %s3258_s23, 32  ;;  %p4382_p2 = scmp.lt.s32.totalorder %s3258_s23, %s3258_s23 }
 0x2c1   :  { %v1914_v18 = vpop.f32.mrf.mxu1  ;;  %v3977_v32 = vpop.f32.mrf.mxu0  ;;  %p4378_p1 = scmp.ne.s32.totalorder %s3258_s23, %s4377_s24  ;;  %p4383_p3 = scmp.lt.s32.totalorder %s4377_s24, %s4377_s24 }
 0x2c3   :  { %v3957_v60 = vpop.f32.mrf.mxu1  ;;  %p4384_p4 = por %p4383_p3, %p4382_p2 }
 0x2c5   :  { %p4385_p5 = pnand %p4384_p4, %p4378_p1 }
 0x2db   :  { %v2235_v21 = vpop.f32.mrf.mxu0 }
 0x2dd   :  { %v2126_v22 = vpop.f32.mrf.mxu1  ;;  %v4016_v37 = vpop.f32.mrf.mxu0 }
 0x2de   :  { %v2132_v17 = vadd.f32 %v2126_v22, %v2025_v16 }
 0x2df   :  { %v3996_v9 = vpop.f32.mrf.mxu1  ;;  %v2238_v39 = vpop.f32.mrf.mxu0 }
 0x2e0   :  { %v2241_v29 = vadd.f32 %v2235_v21, %v2132_v17 }
 0x2e1   :  { %v2129_v30 = vpop.f32.mrf.mxu1  ;;  %v4017_v40 = vpop.f32.mrf.mxu0 }
 0x2e3   :  { %v3997_v61 = vpop.f32.mrf.mxu1 }
 0x2fb   :  { %v2451_v48 = vpop.f32.mrf.mxu0 }
 0x2fd   :  { %v2343_v19 = vpop.f32.mrf.mxu1  ;;  %v4056_v62 = vpop.f32.mrf.mxu0 }
 0x2fe   :  { %v2349_v51 = vadd.f32 %v2343_v19, %v2241_v29 }
 0x2ff   :  { %v4036_v55 = vpop.f32.mrf.mxu1  ;;  %v2454_v52 = vpop.f32.mrf.mxu0 }
 0x300   :  { %v2457_v33 = vadd.f32 %v2451_v48, %v2349_v51 }
 0x301   :  { %v2346_v53 = vpop.f32.mrf.mxu1  ;;  %v4057_v4 = vpop.f32.mrf.mxu0 }
 0x302   :  { %v2465_v44 = vadd.f32 %v3412_v50, %v2457_v33 }
 0x303   :  { %v4037_v54 = vpop.f32.mrf.mxu1 }
 0x304   :  { %v2466_v56 = vmax.f32 %v2465_v44, 0.0 }
 0x306   :  { %v3020_v20 = vpack.c.bf16 %v2466_v56, %v2466_v56 }
 0x308   :  { %4095 = vmatmul.mubr.bf16.vlgmr.msra.gmra.mxu1 %v3020_v20 }
 0x31b   :  { %v3672_v23 = vpop.f32.mrf.mxu0 }
 0x31d   :  { %v3650_v57 = vpop.f32.mrf.mxu1  ;;  %v3673_v58 = vpop.f32.mrf.mxu0 }
 0x31e   :  { %v3674_v49 = vadd.f32 %v3673_v58, %v3672_v23 }
 0x31f   :  { %v3651_v38 = vpop.f32.mrf.mxu1  ;;  %v3675_v1 = vpop.f32.mrf.mxu0 }
 0x320   :  { %v3652_v6 = vadd.f32 %v3651_v38, %v3650_v57 }
 0x321   :  { %v3653_v31 = vpop.f32.mrf.mxu1  ;;  %v3676_v3 = vpop.f32.mrf.mxu0 }
 0x322   :  { %v2934_v8 = vadd.f32 %v3652_v6, %v3414_v41 }
 0x323   :  { %v3654_v27 = vpop.f32.mrf.mxu1 }
 0x324   :  { %v2974_v10 = vadd.f32 %v3674_v49, %v2934_v8 }
 0x33d   :  { %v3694_v2 = vpop.f32.mrf.mxu1 }
 0x33f   :  { %v3695_v12 = vpop.f32.mrf.mxu1 }
 0x340   :  { %v3696_v63 = vadd.f32 %v3695_v12, %v3694_v2 }
 0x341   :  { %v3697_v25 = vpop.f32.mrf.mxu1 }
 0x342   :  { %v3014_v36 = vadd.f32 %v3696_v63, %v2974_v10 }
 0x343   :  { %v3698_v42 = vpop.f32.mrf.mxu1 }
 0x344   :  { %4310 = vtanh.f32 %v3014_v36 }
 0x351   :  { %v4311_v34 = vpop.eup %4310 }
 0x352   :  { %v3037_v47 = vpack.c.bf16 %v4311_v34, %v4311_v34 }
 0x354   :  { %4075 = vmatmul.mubr.bf16.vlgmr.msra.gmra.mxu0 %v3037_v47 }
 0x3c8   :  { %v3224_v0 = vpop.f32.mrf.mxu1 }
 0x3ca   :  { %v4096_v11 = vpop.f32.mrf.mxu1 }
 0x3cc   :  { %v3227_v26 = vpop.f32.mrf.mxu1 }
 0x3ce   :  { %v4097_v5 = vpop.f32.mrf.mxu1 }
 0x414   :  { %v3136_v45 = vpop.f32.mrf.mxu0 }
 0x415   :  { %v3225_v14 = vadd.f32 %v3224_v0, %v3136_v45 }
 0x416   :  { %v4076_v15 = vpop.f32.mrf.mxu0 }
 0x417   :  { %v3237_v24 = vadd.f32 %v3479_v13, %v3225_v14 }
 0x418   :  { %v3139_v7 = vpop.f32.mrf.mxu0 }
 0x419   :  { %v3239_v18 = vsel %vm3238_vm1, %v3237_v24, -inf }
 0x41a   :  { %3240 = vmax.xlane.f32.xlu0 %v3239_v18  ;;  %v4077_v32 = vpop.f32.mrf.mxu0 }
 0x4a3   :  { %v3241_v60 = vpop.xlane.xlu0 %3240 }
 0x4a4   :  { %v3242_v43 = vsub.f32 %v3237_v24, %v3241_v60 }
 0x4a6   :  { %v3243_v35 = vmul.f32 1.442695, %v3242_v43 }
 0x4a8   :  { %4312 = vpow2.f32 %v3243_v35 }
 0x4b5   :  { %v4313_v59 = vpop.eup %4312 }
 0x4b6   :  { %v3245_v28 = vsel %vm3238_vm1, %v4313_v59, 0.0 }
 0x4b7   :  { %3246 = vadd.xlane.f32.xlu0 %v3245_v28 }
 0x540   :  { %v3247_v21 = vpop.xlane.xlu0 %3246 }
 0x541   :  { %4314 = vrcp.f32 %v3247_v21 }
 0x54e   :  { %v4315_v22 = vpop.eup %4314 }
 0x54f   :  { %v3249_v37 = vmul.f32 %v4315_v22, %v4313_v59 }
 0x551   :  { %3250 = vst.msk [vmem:[#allocation8] sm:$0x3] %vm3238_vm1, %v3249_v37 }
 0x552   :  { %4388 = shalt.err (!%p4385_p5)
}
 0x553   :  { %3260 = dma.vmem_to_hbm [thread:$0]  %s3258_s23, 32, %s5474_s12, [#allocation4]  }
 0x554   :  { %4401 = dma.done.wait [#allocation4], 32  }
 0x555   :  { %4402 = vsyncadd [#allocation4], 4294967264 }
 0x556   :  { %3264 = vsyncpa [#allocation3], 1 }
 0x557   :  { %3265 = vsyncpa [#allocation6], 1 }
 0x558   :  { %3266 = vsyncpa [#allocation4], 1 }

</bundles_post_ra>
